<compile_context>
chip_gen: v6e
topology: v6e:2x2x1
jax: 0.10.0
libtpu: 0.0.40
codegen_flags: <defaults>
</compile_context>

<pallas_src>
import jax
import jax.numpy as jnp
from jax import lax
from jax.experimental import pallas as pl
from jax.experimental.pallas import tpu as pltpu

_VMEM_LIMIT = 32 * 1024 * 1024  # per-step use is <= ~24 MiB; leaves headroom on v7x (64 MiB/TC)


# ----------------------------------------------------------------------------
# helpers
# ----------------------------------------------------------------------------
def _round_up(x, m):
    return (x + m - 1) // m * m


def _front_pad(w):
    """Zero rows prepended/appended to a flat (H*W, C) image so every 3x3 tap is a
    constant row shift; multiple of 8 keeps the padded-region stores aligned."""
    return _round_up(w + 1, 8)


def _divisor_tile(dim, align, cap):
    """Largest tile <= cap that is a multiple of `align` and divides `dim`
    (so no padding copies are needed); falls back to `cap` rounded to align."""
    if dim <= cap:
        return dim
    t = cap - (cap % align)
    while t >= align:
        if dim % t == 0:
            return t
        t -= align
    return max(align, cap - (cap % align))


def _bn_stats(s1, s2, cnt):
    # torch training-mode BatchNorm: batch mean, biased variance.
    # NOTE: E[x^2]-E[x]^2 in f32; fine for a forward pass (see review concern).
    mean = s1 / cnt
    var = s2 / cnt - mean * mean
    return mean, var


# ----------------------------------------------------------------------------
# Pallas kernel 1: single-tile-K matmul (bf16 -> f32 acc) + bias + BN partial sums
# Used for the first 7x7/stride-2 conv (im2col, K=98 after 2-pixel packing).
# ----------------------------------------------------------------------------
def _matmul_bias_stats_kernel(a_ref, b_ref, bias_ref, o_ref, st_ref):
    y = jnp.dot(a_ref[...], b_ref[...], preferred_element_type=jnp.float32)
    y = y + bias_ref[...]
    o_ref[...] = y.astype(o_ref.dtype)
    st_ref[...] = jnp.concatenate(
        [jnp.sum(y, axis=0, keepdims=True),
         jnp.sum(y * y, axis=0, keepdims=True)], axis=0)


def pallas_matmul_bias_stats(a, b, bias, cap_m=8192):
    """a:(M,K), b:(K,N), bias:(N,) -> (out (M,N) bf16, col_sum (N,), col_sumsq (N,))."""
    M, K = a.shape
    K2, N = b.shape
    assert K == K2
    tm = _divisor_tile(M, 8, cap_m)
    Mp = _round_up(M, tm)

    a_p = a.astype(jnp.bfloat16)
    if Mp != M:
        a_p = jnp.pad(a_p, ((0, Mp - M), (0, 0)))
    b_p = b.astype(jnp.bfloat16)
    bias_p = bias.astype(jnp.float32).reshape(1, N)

    out, stats = pl.pallas_call(
        _matmul_bias_stats_kernel,
        out_shape=(jax.ShapeDtypeStruct((Mp, N), jnp.bfloat16),
                   jax.ShapeDtypeStruct((Mp // tm, 2, N), jnp.float32)),
        grid_spec=pltpu.PrefetchScalarGridSpec(
            num_scalar_prefetch=0,
            grid=(Mp // tm,),
            in_specs=[
                pl.BlockSpec((tm, K), lambda i: (i, 0)),
                pl.BlockSpec((K, N), lambda i: (0, 0)),
                pl.BlockSpec((1, N), lambda i: (0, 0)),
            ],
            out_specs=(
                pl.BlockSpec((tm, N), lambda i: (i, 0)),
                pl.BlockSpec((None, 2, N), lambda i: (i, 0, 0)),
            ),
        ),
        compiler_params=pltpu.CompilerParams(
            dimension_semantics=("parallel",),
            vmem_limit_bytes=_VMEM_LIMIT),
    )(a_p, b_p, bias_p)

    s = jnp.sum(stats, axis=0)                     # (2, N)
    s1, s2 = s[0], s[1]
    extra = Mp - M                                  # padded rows contribute exactly `bias`
    if extra:
        bb = bias.astype(jnp.float32)
        s1 = s1 - extra * bb
        s2 = s2 - extra * bb * bb
    return out[:M], s1, s2


# ----------------------------------------------------------------------------
# Pallas kernel 2: direct 3x3 / stride-1 / pad-1 conv from a flat, zero-padded
# per-image buffer.  One grid step = one image.  The 9 tap slices (column
# wraparound removed with masks applied to the *input*) are packed into an
# in-VMEM (HW, 9*Cin) im2col scratch, then ONE MXU matmul with K = 9*Cin.
# Emits bf16 output + (2, Cout) BN partial sums.
# ----------------------------------------------------------------------------
def _make_conv3x3_kernel(width, hw, cin, fpad):
    def kernel(x_ref, w_ref, b_ref, ml_ref, mr_ref, o_ref, st_ref, col_ref):
        ml = ml_ref[...]                           # (HW, 1) bf16, 0 where out col == 0
        mr = mr_ref[...]                           # (HW, 1) bf16, 0 where out col == W-1
        for di in range(3):                        # kernel row offset di-1
            for dj in range(3):                    # kernel col offset dj-1
                t = di * 3 + dj
                start = fpad + (di - 1) * width + (dj - 1)   # static slice start
                a = x_ref[pl.ds(start, hw), :]     # (HW, Cin) bf16
                if dj == 0:
                    a = a * ml
                elif dj == 2:
                    a = a * mr
                col_ref[:, t * cin:(t + 1) * cin] = a
        y = jnp.dot(col_ref[...], w_ref[...],
                    preferred_element_type=jnp.float32) + b_ref[...]
        o_ref[...] = y.astype(o_ref.dtype)
        st_ref[...] = jnp.concatenate(
            [jnp.sum(y, axis=0, keepdims=True),
             jnp.sum(y * y, axis=0, keepdims=True)], axis=0)
    return kernel


def pallas_conv3x3_flat(x_flat, w, b, H, W):
    """x_flat: (n, H*W + 2F, Cin) bf16 flat image with F zero rows front/back;
    w: (Cout, Cin, 3, 3) torch layout; b: (Cout,).
    Returns (out (n, H*W, Cout) bf16, col_sum, col_sumsq, count)."""
    n, L, Cin = x_flat.shape
    Cout = w.shape[0]
    assert w.shape[1] == Cin
    HW = H * W
    F = _front_pad(W)
    assert L == HW + 2 * F

    wt = jnp.transpose(w, (2, 3, 1, 0)).reshape(9 * Cin, Cout).astype(jnp.bfloat16)
    bias = b.astype(jnp.float32).reshape(1, Cout)
    col = jnp.arange(HW, dtype=jnp.int32) % W
    ml = (col != 0).astype(jnp.bfloat16).reshape(HW, 1)
    mr = (col != W - 1).astype(jnp.bfloat16).reshape(HW, 1)

    out, stats = pl.pallas_call(
        _make_conv3x3_kernel(W, HW, Cin, F),
        out_shape=(jax.ShapeDtypeStruct((n, HW, Cout), jnp.bfloat16),
                   jax.ShapeDtypeStruct((n, 2, Cout), jnp.float32)),
        grid_spec=pltpu.PrefetchScalarGridSpec(
            num_scalar_prefetch=0,
            grid=(n,),
            in_specs=[
                pl.BlockSpec((None, L, Cin), lambda i: (i, 0, 0)),
                pl.BlockSpec((9 * Cin, Cout), lambda i: (0, 0)),
                pl.BlockSpec((1, Cout), lambda i: (0, 0)),
                pl.BlockSpec((HW, 1), lambda i: (0, 0)),
                pl.BlockSpec((HW, 1), lambda i: (0, 0)),
            ],
            out_specs=(
                pl.BlockSpec((None, HW, Cout), lambda i: (i, 0, 0)),
                pl.BlockSpec((None, 2, Cout), lambda i: (i, 0, 0)),
            ),
            scratch_shapes=[pltpu.VMEM((HW, 9 * Cin), jnp.bfloat16)],
        ),
        compiler_params=pltpu.CompilerParams(
            dimension_semantics=("parallel",),     # shards images across the 2 TCs on v7x
            vmem_limit_bytes=_VMEM_LIMIT),
    )(x_flat, wt, bias, ml, mr)

    s = jnp.sum(stats, axis=0)                     # (2, Cout)
    return out, s[0], s[1], n * HW


# ----------------------------------------------------------------------------
# Pallas kernel 3: fused per-channel affine (BatchNorm, batch stats) + ReLU
# ----------------------------------------------------------------------------
def _bn_relu_kernel(x_ref, s_ref, t_ref, o_ref):
    y = x_ref[...].astype(jnp.float32) * s_ref[...] + t_ref[...]
    o_ref[...] = jnp.maximum(y, 0.0).astype(o_ref.dtype)


def pallas_bn_relu(x, mean, var, gamma, beta, eps=1e-5,
                   out_dtype=jnp.bfloat16, cap_m=4096):
    """x: (M, C) (bf16 or f32).  BatchNorm with the given batch stats, then ReLU."""
    M, C = x.shape
    inv = gamma.astype(jnp.float32) * lax.rsqrt(var.astype(jnp.float32) + eps)
    scale = inv
    shift = beta.astype(jnp.float32) - mean.astype(jnp.float32) * inv

    fold = 1
    if C < 128 and 128 % C == 0 and M % (128 // C) == 0:
        fold = 128 // C                            # lane-dense stores for C=64
        x = x.reshape(M // fold, C * fold)
        scale = jnp.tile(scale, fold)
        shift = jnp.tile(shift, fold)
        M, C = x.shape
    scale = scale.reshape(1, C)
    shift = shift.reshape(1, C)

    tm = _divisor_tile(M, 8, cap_m)
    Mp = _round_up(M, tm)
    x_in = x
    if Mp != M:
        x_in = jnp.pad(x_in, ((0, Mp - M), (0, 0)))

    out = pl.pallas_call(
        _bn_relu_kernel,
        out_shape=jax.ShapeDtypeStruct((Mp, C), out_dtype),
        grid_spec=pltpu.PrefetchScalarGridSpec(
            num_scalar_prefetch=0,
            grid=(Mp // tm,),
            in_specs=[
                pl.BlockSpec((tm, C), lambda i: (i, 0)),
                pl.BlockSpec((1, C), lambda i: (0, 0)),
                pl.BlockSpec((1, C), lambda i: (0, 0)),
            ],
            out_specs=pl.BlockSpec((tm, C), lambda i: (i, 0)),
        ),
        compiler_params=pltpu.CompilerParams(
            dimension_semantics=("parallel",),
            vmem_limit_bytes=_VMEM_LIMIT),
    )(x_in, scale, shift)

    out = out[:M]
    if fold > 1:
        out = out.reshape(M * fold, C // fold)
    return out


# ----------------------------------------------------------------------------
# Pallas kernel 4: BN + ReLU written directly into the NEXT conv's flat padded
# layout (zero borders), removing the separate jnp.pad HBM pass.
# ----------------------------------------------------------------------------
def _make_bn_relu_pad_kernel(hw, fpad):
    def kernel(x_ref, s_ref, t_ref, o_ref):
        C = o_ref.shape[1]
        zeros = jnp.zeros((fpad, C), o_ref.dtype)
        o_ref[pl.ds(0, fpad), :] = zeros
        o_ref[pl.ds(fpad + hw, fpad), :] = zeros
        y = x_ref[...].astype(jnp.float32) * s_ref[...] + t_ref[...]
        o_ref[pl.ds(fpad, hw), :] = jnp.maximum(y, 0.0).astype(o_ref.dtype)
    return kernel


def pallas_bn_relu_pad(x, mean, var, gamma, beta, W, eps=1e-5):
    """x: (n, HW, C) conv output -> (n, HW + 2F, C) bf16 flat buffer, borders zero."""
    n, HW, C = x.shape
    F = _front_pad(W)
    L = HW + 2 * F
    inv = gamma.astype(jnp.float32) * lax.rsqrt(var.astype(jnp.float32) + eps)
    scale = inv.reshape(1, C)
    shift = (beta.astype(jnp.float32) - mean.astype(jnp.float32) * inv).reshape(1, C)

    return pl.pallas_call(
        _make_bn_relu_pad_kernel(HW, F),
        out_shape=jax.ShapeDtypeStruct((n, L, C), jnp.bfloat16),
        grid_spec=pltpu.PrefetchScalarGridSpec(
            num_scalar_prefetch=0,
            grid=(n,),
            in_specs=[
                pl.BlockSpec((None, HW, C), lambda i: (i, 0, 0)),
                pl.BlockSpec((1, C), lambda i: (0, 0)),
                pl.BlockSpec((1, C), lambda i: (0, 0)),
            ],
            out_specs=pl.BlockSpec((None, L, C), lambda i: (i, 0, 0)),
        ),
        compiler_params=pltpu.CompilerParams(
            dimension_semantics=("parallel",),
            vmem_limit_bytes=_VMEM_LIMIT),
    )(x, scale, shift)


# ----------------------------------------------------------------------------
# conv / pool building blocks
# ----------------------------------------------------------------------------
def pad_nhwc_to_flat(x):
    """(n,H,W,C) -> (n, H*W + 2F, C) bf16 flat buffer with zero borders."""
    n, H, W, C = x.shape
    F = _front_pad(W)
    xf = x.astype(jnp.bfloat16).reshape(n, H * W, C)
    return jnp.pad(xf, ((0, 0), (F, F), (0, 0)))


def conv7x7_s2_bn_relu(x, p):
    """First layer: 7x7 stride-2 pad-3 conv (im2col, 2-pixel packing -> K=98/N=128)
    + BatchNorm(batch stats) + ReLU.  Returns bf16 NHWC."""
    n, H, W, Cin = x.shape
    kh = kw = 7
    stride, pad = 2, 3
    Ho = (H + 2 * pad - kh) // stride + 1
    Wo = (W + 2 * pad - kw) // stride + 1
    Cout = p['w'].shape[0]

    # TODO(synk): the im2col gather for the 7x7/stride-2 conv stays in XLA
    # (49 strided slices + stack); a direct Pallas kernel would save ~10 MB HBM.
    xp = jnp.pad(x, ((0, 0), (pad, pad), (pad, pad), (0, 0))).astype(jnp.bfloat16)
    cols = []
    for i in range(kh):
        for j in range(kw):
            cols.append(xp[:, i::stride, j::stride, :][:, :Ho, :Wo, :])
    patches = jnp.stack(cols, axis=3)              # (n, Ho, Wo, 49, Cin) bf16
    M = n * Ho * Wo
    K = kh * kw * Cin
    a = patches.reshape(M, K)
    wm = jnp.transpose(p['w'], (2, 3, 1, 0)).reshape(K, Cout).astype(jnp.bfloat16)

    if M % 2 == 0 and Cout <= 64:
        # pack two adjacent output pixels: lane-dense (..,128) output, K doubled.
        a2 = a.reshape(M // 2, 2 * K)              # free, row-major
        wb = jnp.zeros((2 * K, 2 * Cout), jnp.bfloat16)
        wb = wb.at[:K, :Cout].set(wm).at[K:, Cout:].set(wm)
        bias2 = jnp.concatenate([p['b'], p['b']])
        y2, s1p, s2p = pallas_matmul_bias_stats(a2, wb, bias2)
        y = y2.reshape(M, Cout)                    # free, row-major
        s1 = s1p[:Cout] + s1p[Cout:]
        s2 = s2p[:Cout] + s2p[Cout:]
    else:
        y, s1, s2 = pallas_matmul_bias_stats(a, wm, p['b'])

    mean, var = _bn_stats(s1, s2, M)
    z = pallas_bn_relu(y, mean, var, p['gamma'], p['beta'], out_dtype=jnp.bfloat16)
    return z.reshape(n, Ho, Wo, Cout)


def conv3_bn_relu_to_flat(x_flat, p, H, W):
    """3x3 conv on a flat padded buffer; BN(batch stats)+ReLU written directly into
    the NEXT conv's flat padded layout."""
    y, s1, s2, cnt = pallas_conv3x3_flat(x_flat, p['w'], p['b'], H, W)
    mean, var = _bn_stats(s1, s2, cnt)
    return pallas_bn_relu_pad(y, mean, var, p['gamma'], p['beta'], W)


def conv3_bn_relu_to_nhwc(x_flat, p, H, W, out_dtype):
    """3x3 conv on a flat padded buffer; BN+ReLU to an NHWC tensor (for pool/heads)."""
    y, s1, s2, cnt = pallas_conv3x3_flat(x_flat, p['w'], p['b'], H, W)
    n, _, Cout = y.shape
    mean, var = _bn_stats(s1, s2, cnt)
    cap_m = 2048 if out_dtype == jnp.float32 else 4096
    z = pallas_bn_relu(y.reshape(n * H * W, Cout), mean, var,
                       p['gamma'], p['beta'], out_dtype=out_dtype, cap_m=cap_m)
    return z.reshape(n, H, W, Cout)


def max_pool_nhwc(x, k, stride, pad):
    # TODO(synk): max-pooling stays as lax.reduce_window glue (no dedicated Pallas kernel).
    return lax.reduce_window(
        x, jnp.array(-jnp.inf, dtype=x.dtype), lax.max,
        (1, k, k, 1), (1, stride, stride, 1),
        [(0, 0), (pad, pad), (pad, pad), (0, 0)])


def kneenet_features(x, fp):
    """KneeNet([64,128,256,256,512,512]).features[:-1]; x: (N, 224, 224, 1) NHWC f32."""
    x = conv7x7_s2_bn_relu(x, fp['c0'])                        # -> 112x112x64 (bf16)
    x = max_pool_nhwc(x, 3, 2, 1)                              # -> 56x56x64
    xf = pad_nhwc_to_flat(x)                                   # -> flat 56x56, zero borders
    xf = conv3_bn_relu_to_flat(xf, fp['c1'], 56, 56)           # -> flat 56x56x128
    x = conv3_bn_relu_to_nhwc(xf, fp['c2'], 56, 56, jnp.bfloat16)   # -> 56x56x256
    x = max_pool_nhwc(x, 2, 2, 0)                              # -> 28x28x256
    xf = pad_nhwc_to_flat(x)                                   # -> flat 28x28
    xf = conv3_bn_relu_to_flat(xf, fp['c3'], 28, 28)           # -> flat 28x28x256
    xf = conv3_bn_relu_to_flat(xf, fp['c4'], 28, 28)           # -> flat 28x28x512
    x = conv3_bn_relu_to_nhwc(xf, fp['c5'], 28, 28, jnp.float32)    # -> 28x28x512 (f32 heads)
    return x


# ----------------------------------------------------------------------------
# DefModel forward
# ----------------------------------------------------------------------------
def def_model_forward(x_list, params, zlen, out_class, l1=512, l2=28):
    bsize = x_list[0].shape[0]

    w_cls = params['cls_w']                  # (out_class, zlen*l1)
    b_cls = params['cls_b']                  # (out_class,)
    # fusion_method == 'cat': attention conv weight tied to classifier row 0
    w_att0 = w_cls[0, :zlen * l1].reshape(zlen, l1)

    # (b, 1, H, W, z) -> permute(0,4,1,2,3) -> (b*z, 1, H, W) ; NHWC here.
    xs = []
    for xi in x_list:
        b, c, H, W, z = xi.shape
        xs.append(jnp.transpose(xi, (0, 4, 2, 3, 1)).reshape(b * z, H, W, c))

    # both streams share features0 when xlen == 2 -> run the backbone once, batched
    x_all = jnp.concatenate(xs, axis=0)                    # (2*b*z, H, W, 1)
    fm = kneenet_features(x_all, params['feat0'])          # (2*b*z, 28, 28, 512) f32
    fm_r = fm.reshape(2, bsize, zlen, l2 * l2, l1)

    # attention maps (1x1 conv channel ii on slice ii) -- tiny, left to XLA
    att = jnp.einsum('sbzpc,zc->sbzp', fm_r, w_att0)       # (2, b, z, l2*l2)
    att2 = att.reshape(2, bsize, zlen * l2 * l2)
    amax = jnp.max(att2, axis=2, keepdims=True)
    amin = jnp.min(att2, axis=2, keepdims=True)
    denom = jnp.where(amax - amin == 0, 1.0, amax - amin)  # guard constant maps
    attn = ((att2 - amin) / denom).reshape(2, bsize, zlen, l2, l2)
    attentions = [attn[0], attn[1]]

    # compare left and right: AvgPool2d(l2) + view(bsize, zlen, l1)
    pooled = jnp.mean(fm_r, axis=3)                        # (2, b, z, l1)
    x = (pooled[0] - pooled[1]).reshape(bsize, zlen * l1)
    features = x

    # classification (tiny matmul -> plain XLA)
    x = jnp.maximum(x, 0.0)
    logits = x @ w_cls.T + b_cls
    if out_class == 1:
        logits = jax.nn.sigmoid(logits)
    return logits, features, attentions


# ----------------------------------------------------------------------------
# deterministic parameter init
# ----------------------------------------------------------------------------
def init_params(key, zlen, out_class):
    FilNum = [64, 128, 256, 256, 512, 512]
    specs = [(1, FilNum[0], 7),
             (FilNum[0], FilNum[1], 3),
             (FilNum[1], FilNum[2], 3),
             (FilNum[2], FilNum[3], 3),
             (FilNum[3], FilNum[4], 3),
             (FilNum[4], FilNum[5], 3)]
    keys = jax.random.split(key, 2 * len(specs) + 2)
    feat = {}
    for idx, (cin, cout, k) in enumerate(specs):
        kw_, kb_ = keys[2 * idx], keys[2 * idx + 1]
        feat[f'c{idx}'] = dict(
            w=jax.random.normal(kw_, (cout, cin, k, k), jnp.float32)
              * (1.0 / (cin * k * k) ** 0.5),
            b=jax.random.normal(kb_, (cout,), jnp.float32) * 0.01,
            gamma=jnp.ones((cout,), jnp.float32),
            beta=jnp.zeros((cout,), jnp.float32))
    l1 = 512
    # classifier weight = column-tiled (out_class, l1) block (as in __init__)
    w0 = jax.random.normal(keys[-2], (out_class, l1), jnp.float32) * 0.02
    cls_w = jnp.tile(w0, (1, zlen))
    cls_b = jax.random.normal(keys[-1], (out_class,), jnp.float32) * 0.01
    return {'feat0': feat, 'cls_w': cls_w, 'cls_b': cls_b}


# ----------------------------------------------------------------------------
# small runtime self-test of the flat-buffer / column-mask 3x3 conv scheme
# ----------------------------------------------------------------------------
def _self_test_conv3x3():
    key = jax.random.PRNGKey(1)
    kx, kw, kb = jax.random.split(key, 3)
    n, H, W, Cin, Cout = 2, 8, 8, 64, 128
    x = jax.random.normal(kx, (n, H, W, Cin), jnp.float32)
    w = jax.random.normal(kw, (Cout, Cin, 3, 3), jnp.float32) / (Cin * 9) ** 0.5
    b = jax.random.normal(kb, (Cout,), jnp.float32) * 0.1
    xb = x.astype(jnp.bfloat16)
    wb = w.astype(jnp.bfloat16)

    xf = pad_nhwc_to_flat(xb)
    y, _, _, _ = pallas_conv3x3_flat(xf, w, b, H, W)
    y = y.reshape(n, H, W, Cout).astype(jnp.float32)

    ref = lax.conv_general_dilated(
        xb.astype(jnp.float32),
        jnp.transpose(wb.astype(jnp.float32), (2, 3, 1, 0)),
        window_strides=(1, 1), padding=((1, 1), (1, 1)),
        dimension_numbers=('NHWC', 'HWIO', 'NHWC')) + b
    err = float(jnp.max(jnp.abs(y - ref)))
    assert err < 7.5e-2, f"conv3x3 self-test failed, max abs err {err}"


# ----------------------------------------------------------------------------
# main
# ----------------------------------------------------------------------------
if __name__ == "__main__":
    _self_test_conv3x3()

    bsize, zlen, out_class, H = 2, 2, 2, 224   # H must be 224 for l2 == 28
    key = jax.random.PRNGKey(0)
    kp, k0, k1 = jax.random.split(key, 3)
    params = init_params(kp, zlen, out_class)

    x0 = jax.random.normal(k0, (bsize, 1, H, H, zlen), jnp.float32)
    x1 = jax.random.normal(k1, (bsize, 1, H, H, zlen), jnp.float32)

    fwd = jax.jit(lambda xl, p: def_model_forward(xl, p, zlen=zlen,
                                                  out_class=out_class))
    logits, features, attentions = fwd([x0, x1], params)
    jax.block_until_ready((logits, features, attentions))

    assert logits.shape == (bsize, out_class)
    assert features.shape == (bsize, zlen * 512)
    assert len(attentions) == 2 and attentions[0].shape == (bsize, zlen, 28, 28)
    assert bool(jnp.all(jnp.isfinite(logits)))
    assert bool(jnp.all(jnp.isfinite(features)))
    print("KERNEL_OK")
</pallas_src>

<mosaic_0001>
module attributes {stable_mosaic.version = 11 : i64} {
  func.func @kernel(%arg0: i32, %arg1: memref<1x96x64xbf16, #tpu.memory_space<vmem>>, %arg2: memref<576x128xbf16, #tpu.memory_space<vmem>>, %arg3: memref<1x128xf32, #tpu.memory_space<vmem>>, %arg4: memref<64x1xbf16, #tpu.memory_space<vmem>>, %arg5: memref<64x1xbf16, #tpu.memory_space<vmem>>, %arg6: memref<1x64x128xbf16, #tpu.memory_space<vmem>>, %arg7: memref<1x2x128xf32, #tpu.memory_space<vmem>>, %arg8: memref<64x576xbf16, #tpu.memory_space<vmem>>) attributes {dimension_semantics = [#tpu.dimension_semantics<parallel>], iteration_bounds = array<i64: 2>, scalar_prefetch = 0 : i64, scratch_operands = 1 : i64, tpu.core_type = #tpu.core_type<tc>, window_params = [{transform_indices = @transform_0, window_bounds = array<i64: 1, 96, 64>}, {pipeline_mode = #tpu.pipeline_mode<synchronous>, transform_indices = @transform_1, window_bounds = array<i64: 576, 128>}, {pipeline_mode = #tpu.pipeline_mode<synchronous>, transform_indices = @transform_2, window_bounds = array<i64: 1, 128>}, {pipeline_mode = #tpu.pipeline_mode<synchronous>, transform_indices = @transform_3, window_bounds = array<i64: 64, 1>}, {pipeline_mode = #tpu.pipeline_mode<synchronous>, transform_indices = @transform_4, window_bounds = array<i64: 64, 1>}, {transform_indices = @transform_5, window_bounds = array<i64: 1, 64, 128>}, {transform_indices = @transform_6, window_bounds = array<i64: 1, 2, 128>}]} {
    %c0 = arith.constant 0 : index
    %c0_0 = arith.constant 0 : index
    %0 = vector.load %arg4[%c0, %c0_0] : memref<64x1xbf16, #tpu.memory_space<vmem>>, vector<64x1xbf16>
    %c0_1 = arith.constant 0 : index
    %c0_2 = arith.constant 0 : index
    %1 = vector.load %arg5[%c0_1, %c0_2] : memref<64x1xbf16, #tpu.memory_space<vmem>>, vector<64x1xbf16>
    %c0_3 = arith.constant 0 : index
    %c7 = arith.constant 7 : index
    %c0_4 = arith.constant 0 : index
    %2 = vector.load %arg1[%c0_3, %c7, %c0_4] : memref<1x96x64xbf16, #tpu.memory_space<vmem>>, vector<1x64x64xbf16>
    %3 = vector.shape_cast %2 : vector<1x64x64xbf16> to vector<64x64xbf16>
    %4 = vector.broadcast %0 : vector<64x1xbf16> to vector<64x64xbf16>
    %5 = arith.mulf %3, %4 : vector<64x64xbf16>
    %c0_5 = arith.constant 0 : index
    %c0_6 = arith.constant 0 : index
    %6 = vector.load %arg8[%c0_5, %c0_6] : memref<64x576xbf16, #tpu.memory_space<vmem>>, vector<64x64xbf16>
    tpu.vector_store %arg8[%c0_5, %c0_6], %5 {strides = array<i32>} : memref<64x576xbf16, #tpu.memory_space<vmem>>, vector<64x64xbf16>,
    %c0_7 = arith.constant 0 : index
    %c8 = arith.constant 8 : index
    %c0_8 = arith.constant 0 : index
    %7 = vector.load %arg1[%c0_7, %c8, %c0_8] : memref<1x96x64xbf16, #tpu.memory_space<vmem>>, vector<1x64x64xbf16>
    %8 = vector.shape_cast %7 : vector<1x64x64xbf16> to vector<64x64xbf16>
    %c0_9 = arith.constant 0 : index
    %c64 = arith.constant 64 : index
    %9 = vector.load %arg8[%c0_9, %c64] : memref<64x576xbf16, #tpu.memory_space<vmem>>, vector<64x64xbf16>
    tpu.vector_store %arg8[%c0_9, %c64], %8 {strides = array<i32>} : memref<64x576xbf16, #tpu.memory_space<vmem>>, vector<64x64xbf16>,
    %c0_10 = arith.constant 0 : index
    %c9 = arith.constant 9 : index
    %c0_11 = arith.constant 0 : index
    %10 = vector.load %arg1[%c0_10, %c9, %c0_11] : memref<1x96x64xbf16, #tpu.memory_space<vmem>>, vector<1x64x64xbf16>
    %11 = vector.shape_cast %10 : vector<1x64x64xbf16> to vector<64x64xbf16>
    %12 = vector.broadcast %1 : vector<64x1xbf16> to vector<64x64xbf16>
    %13 = arith.mulf %11, %12 : vector<64x64xbf16>
    %c0_12 = arith.constant 0 : index
    %c128 = arith.constant 128 : index
    %14 = vector.load %arg8[%c0_12, %c128] : memref<64x576xbf16, #tpu.memory_space<vmem>>, vector<64x64xbf16>
    tpu.vector_store %arg8[%c0_12, %c128], %13 {strides = array<i32>} : memref<64x576xbf16, #tpu.memory_space<vmem>>, vector<64x64xbf16>,
    %c0_13 = arith.constant 0 : index
    %c15 = arith.constant 15 : index
    %c0_14 = arith.constant 0 : index
    %15 = vector.load %arg1[%c0_13, %c15, %c0_14] : memref<1x96x64xbf16, #tpu.memory_space<vmem>>, vector<1x64x64xbf16>
    %16 = vector.shape_cast %15 : vector<1x64x64xbf16> to vector<64x64xbf16>
    %17 = vector.broadcast %0 : vector<64x1xbf16> to vector<64x64xbf16>
    %18 = arith.mulf %16, %17 : vector<64x64xbf16>
    %c0_15 = arith.constant 0 : index
    %c192 = arith.constant 192 : index
    %19 = vector.load %arg8[%c0_15, %c192] : memref<64x576xbf16, #tpu.memory_space<vmem>>, vector<64x64xbf16>
    tpu.vector_store %arg8[%c0_15, %c192], %18 {strides = array<i32>} : memref<64x576xbf16, #tpu.memory_space<vmem>>, vector<64x64xbf16>,
    %c0_16 = arith.constant 0 : index
    %c16 = arith.constant 16 : index
    %c0_17 = arith.constant 0 : index
    %20 = vector.load %arg1[%c0_16, %c16, %c0_17] : memref<1x96x64xbf16, #tpu.memory_space<vmem>>, vector<1x64x64xbf16>
    %21 = vector.shape_cast %20 : vector<1x64x64xbf16> to vector<64x64xbf16>
    %c0_18 = arith.constant 0 : index
    %c256 = arith.constant 256 : index
    %22 = vector.load %arg8[%c0_18, %c256] : memref<64x576xbf16, #tpu.memory_space<vmem>>, vector<64x64xbf16>
    tpu.vector_store %arg8[%c0_18, %c256], %21 {strides = array<i32>} : memref<64x576xbf16, #tpu.memory_space<vmem>>, vector<64x64xbf16>,
    %c0_19 = arith.constant 0 : index
    %c17 = arith.constant 17 : index
    %c0_20 = arith.constant 0 : index
    %23 = vector.load %arg1[%c0_19, %c17, %c0_20] : memref<1x96x64xbf16, #tpu.memory_space<vmem>>, vector<1x64x64xbf16>
    %24 = vector.shape_cast %23 : vector<1x64x64xbf16> to vector<64x64xbf16>
    %25 = vector.broadcast %1 : vector<64x1xbf16> to vector<64x64xbf16>
    %26 = arith.mulf %24, %25 : vector<64x64xbf16>
    %c0_21 = arith.constant 0 : index
    %c320 = arith.constant 320 : index
    %27 = vector.load %arg8[%c0_21, %c320] : memref<64x576xbf16, #tpu.memory_space<vmem>>, vector<64x64xbf16>
    tpu.vector_store %arg8[%c0_21, %c320], %26 {strides = array<i32>} : memref<64x576xbf16, #tpu.memory_space<vmem>>, vector<64x64xbf16>,
    %c0_22 = arith.constant 0 : index
    %c23 = arith.constant 23 : index
    %c0_23 = arith.constant 0 : index
    %28 = vector.load %arg1[%c0_22, %c23, %c0_23] : memref<1x96x64xbf16, #tpu.memory_space<vmem>>, vector<1x64x64xbf16>
    %29 = vector.shape_cast %28 : vector<1x64x64xbf16> to vector<64x64xbf16>
    %30 = vector.broadcast %0 : vector<64x1xbf16> to vector<64x64xbf16>
    %31 = arith.mulf %29, %30 : vector<64x64xbf16>
    %c0_24 = arith.constant 0 : index
    %c384 = arith.constant 384 : index
    %32 = vector.load %arg8[%c0_24, %c384] : memref<64x576xbf16, #tpu.memory_space<vmem>>, vector<64x64xbf16>
    tpu.vector_store %arg8[%c0_24, %c384], %31 {strides = array<i32>} : memref<64x576xbf16, #tpu.memory_space<vmem>>, vector<64x64xbf16>,
    %c0_25 = arith.constant 0 : index
    %c24 = arith.constant 24 : index
    %c0_26 = arith.constant 0 : index
    %33 = vector.load %arg1[%c0_25, %c24, %c0_26] : memref<1x96x64xbf16, #tpu.memory_space<vmem>>, vector<1x64x64xbf16>
    %34 = vector.shape_cast %33 : vector<1x64x64xbf16> to vector<64x64xbf16>
    %c0_27 = arith.constant 0 : index
    %c448 = arith.constant 448 : index
    %35 = vector.load %arg8[%c0_27, %c448] : memref<64x576xbf16, #tpu.memory_space<vmem>>, vector<64x64xbf16>
    tpu.vector_store %arg8[%c0_27, %c448], %34 {strides = array<i32>} : memref<64x576xbf16, #tpu.memory_space<vmem>>, vector<64x64xbf16>,
    %c0_28 = arith.constant 0 : index
    %c25 = arith.constant 25 : index
    %c0_29 = arith.constant 0 : index
    %36 = vector.load %arg1[%c0_28, %c25, %c0_29] : memref<1x96x64xbf16, #tpu.memory_space<vmem>>, vector<1x64x64xbf16>
    %37 = vector.shape_cast %36 : vector<1x64x64xbf16> to vector<64x64xbf16>
    %38 = vector.broadcast %1 : vector<64x1xbf16> to vector<64x64xbf16>
    %39 = arith.mulf %37, %38 : vector<64x64xbf16>
    %c0_30 = arith.constant 0 : index
    %c512 = arith.constant 512 : index
    %40 = vector.load %arg8[%c0_30, %c512] : memref<64x576xbf16, #tpu.memory_space<vmem>>, vector<64x64xbf16>
    tpu.vector_store %arg8[%c0_30, %c512], %39 {strides = array<i32>} : memref<64x576xbf16, #tpu.memory_space<vmem>>, vector<64x64xbf16>,
    %c0_31 = arith.constant 0 : index
    %c0_32 = arith.constant 0 : index
    %41 = vector.load %arg8[%c0_31, %c0_32] : memref<64x576xbf16, #tpu.memory_space<vmem>>, vector<64x576xbf16>
    %c0_33 = arith.constant 0 : index
    %c0_34 = arith.constant 0 : index
    %42 = vector.load %arg2[%c0_33, %c0_34] : memref<576x128xbf16, #tpu.memory_space<vmem>>, vector<576x128xbf16>
    %cst = arith.constant dense<0.000000e+00> : vector<64x128xf32>
    %43 = tpu.matmul %41, %42, %cst {dimension_numbers = #tpu.dot_dimension_numbers<[1], [0], [0], [1], [0, 0, 1, 1], [], []>} : vector<64x576xbf16>, vector<576x128xbf16>, vector<64x128xf32> -> vector<64x128xf32>
    %c0_35 = arith.constant 0 : index
    %c0_36 = arith.constant 0 : index
    %44 = vector.load %arg3[%c0_35, %c0_36] : memref<1x128xf32, #tpu.memory_space<vmem>>, vector<1x128xf32>
    %45 = vector.broadcast %44 : vector<1x128xf32> to vector<64x128xf32>
    %46 = arith.addf %43, %45 : vector<64x128xf32>
    %47 = arith.truncf %46 : vector<64x128xf32> to vector<64x128xbf16>
    %c0_37 = arith.constant 0 : index
    %c0_38 = arith.constant 0 : index
    %c0_39 = arith.constant 0 : index
    %48 = vector.load %arg6[%c0_37, %c0_38, %c0_39] : memref<1x64x128xbf16, #tpu.memory_space<vmem>>, vector<1x64x128xbf16>
    %49 = vector.shape_cast %48 : vector<1x64x128xbf16> to vector<64x128xbf16>
    %50 = vector.shape_cast %47 : vector<64x128xbf16> to vector<1x64x128xbf16>
    tpu.vector_store %arg6[%c0_37, %c0_38, %c0_39], %50 {strides = array<i32>} : memref<1x64x128xbf16, #tpu.memory_space<vmem>>, vector<1x64x128xbf16>,
    %cst_40 = arith.constant dense<0.000000e+00> : vector<128xf32>
    %51 = vector.multi_reduction <add>, %46, %cst_40 [0] : vector<64x128xf32> to vector<128xf32>
    %52 = vector.shape_cast %51 : vector<128xf32> to vector<1x128xf32>
    %53 = arith.mulf %46, %46 : vector<64x128xf32>
    %cst_41 = arith.constant dense<0.000000e+00> : vector<128xf32>
    %54 = vector.multi_reduction <add>, %53, %cst_41 [0] : vector<64x128xf32> to vector<128xf32>
    %55 = vector.shape_cast %54 : vector<128xf32> to vector<1x128xf32>
    %56 = tpu.concatenate %52, %55 in 0 : vector<1x128xf32>, vector<1x128xf32> -> vector<2x128xf32>
    %c0_42 = arith.constant 0 : index
    %c0_43 = arith.constant 0 : index
    %c0_44 = arith.constant 0 : index
    %57 = vector.load %arg7[%c0_42, %c0_43, %c0_44] : memref<1x2x128xf32, #tpu.memory_space<vmem>>, vector<1x2x128xf32>
    %58 = vector.shape_cast %57 : vector<1x2x128xf32> to vector<2x128xf32>
    %59 = vector.shape_cast %56 : vector<2x128xf32> to vector<1x2x128xf32>
    tpu.vector_store %arg7[%c0_42, %c0_43, %c0_44], %59 {strides = array<i32>} : memref<1x2x128xf32, #tpu.memory_space<vmem>>, vector<1x2x128xf32>,
    return
  }
  func.func @transform_0(%arg0: i32) -> (i32, i32, i32) {
    %c0_i32 = arith.constant 0 : i32
    %c0_i32_0 = arith.constant 0 : i32
    %c0_i32_1 = arith.constant 0 : i32
    return %arg0, %c0_i32, %c0_i32_0 : i32, i32, i32
  }
  func.func @transform_1(%arg0: i32) -> (i32, i32) {
    %c0_i32 = arith.constant 0 : i32
    %c0_i32_0 = arith.constant 0 : i32
    %c0_i32_1 = arith.constant 0 : i32
    return %c0_i32, %c0_i32_0 : i32, i32
  }
  func.func @transform_2(%arg0: i32) -> (i32, i32) {
    %c0_i32 = arith.constant 0 : i32
    %c0_i32_0 = arith.constant 0 : i32
    %c0_i32_1 = arith.constant 0 : i32
    return %c0_i32, %c0_i32_0 : i32, i32
  }
  func.func @transform_3(%arg0: i32) -> (i32, i32) {
    %c0_i32 = arith.constant 0 : i32
    %c0_i32_0 = arith.constant 0 : i32
    %c0_i32_1 = arith.constant 0 : i32
    return %c0_i32, %c0_i32_0 : i32, i32
  }
  func.func @transform_4(%arg0: i32) -> (i32, i32) {
    %c0_i32 = arith.constant 0 : i32
    %c0_i32_0 = arith.constant 0 : i32
    %c0_i32_1 = arith.constant 0 : i32
    return %c0_i32, %c0_i32_0 : i32, i32
  }
  func.func @transform_5(%arg0: i32) -> (i32, i32, i32) {
    %c0_i32 = arith.constant 0 : i32
    %c0_i32_0 = arith.constant 0 : i32
    %c0_i32_1 = arith.constant 0 : i32
    return %arg0, %c0_i32, %c0_i32_0 : i32, i32, i32
  }
  func.func @transform_6(%arg0: i32) -> (i32, i32, i32) {
    %c0_i32 = arith.constant 0 : i32
    %c0_i32_0 = arith.constant 0 : i32
    %c0_i32_1 = arith.constant 0 : i32
    return %arg0, %c0_i32, %c0_i32_0 : i32, i32, i32
  }
}

</mosaic_0001>

<bundles_post_ra>
// kernel: tpu_custom_call.1
= control target key start
LH: loop header
LB: loop body
LE: loop exit
PB: predicated region body
PF: predicated region fallthrough
CT: control target
= control target key end

     0   :  { %12 = vsyncpa [#allocation4], 0  ;;  %s3816_s0 = inlined_call_operand.vmem [shape: bf16[2,96,64], index: 0, kind: input, shape index: {}]   ;;  %s3817_s1 = inlined_call_operand.hbm [shape: bf16[576,128], index: 1, kind: input, shape index: {}]   ;;  %s3818_s2 = inlined_call_operand.vmem [shape: f32[1,128], index: 2, kind: input, shape index: {}]   ;;  %s3819_s3 = inlined_call_operand.vmem [shape: bf16[64,1], index: 3, kind: input, shape index: {}]   ;;  %s3820_s4 = inlined_call_operand.vmem [shape: bf16[64,1], index: 4, kind: input, shape index: {}]   ;;  %s3821_s5 = inlined_call_operand.hbm [shape: bf16[2,64,128], index: 5, kind: output, shape index: {0}]   ;;  %s3822_s6 = inlined_call_operand.hbm [shape: f32[2,2,128], index: 6, kind: output, shape index: {1}]  }
   0x1   :  { %13 = vsyncpa [#allocation5], 0 }
   0x2   :  { %15 = vsyncpa [#allocation5 + $0x1], 0 }
   0x3   :  { %16 = vsyncpa [#allocation8], 0 }
   0x4   :  { %18 = vsyncpa [#allocation8 + $0x1], 0  ;;  %s2855_s21 = smov 0   ;;  %s2857_s22 = smov 0  }
   0x5   :  { %s2859_s23 = smov 0   ;;  %s2861_s24 = smov 0  }
   0x6 LB: > { %s2876_s25 = sadd.s32 4294967295, %s2809_s24   ;;  %s2331_s26 = sadd.s32 4294967294, %s2809_s24   ;;  %s2809_s24 = sphi %s2861_s24, %s3913_s24   ;;  %s2805_s23 = sphi %s2859_s23, %s3912_s23   ;;  %s2801_s22 = sphi %s2857_s22, %s3911_s22   ;;  %s2797_s21 = sphi %s2855_s21, %s3910_s21  }
   0x7   : > { %s2880_s27 = sadd.s32 1, %s2809_s24   ;;  %s141_s28 = sadd.s32 1, %s2805_s23 }
   0x8   : > { %s138_s29 = ssub.s32 %s2809_s24, %s2880_s27  ;;  %p151_p0 = scmp.ne.s32.totalorder %s2805_s23, %s2801_s22 }
   0x9   : > { %p139_p1 = scmp.eq.s32.totalorder %s138_s29, 0  ;;  %p152_p2 = scmp.eq.s32.totalorder %s2876_s25, 1 }
   0xa   : > { %p157_p3 = scmp.ne.s32.totalorder %s2801_s22, %s2797_s21  ;;  %p158_p4 = scmp.eq.s32.totalorder %s2331_s26, 1 }
   0xb   : > { %s2891_s30 = scalar_select %p139_p1, %s2805_s23, %s141_s28  }
   0xc   : > { %p2893_p5 = por %p152_p2, %p151_p0  ;;  %p2897_p6 = por %p158_p4, %p157_p3 }
   0xd   : > { %p2332_p7 = scmp.ge.s32.totalorder %s2809_s24, 1  ;;  %p191_p8 = scmp.lt.s32.totalorder %s2809_s24, 3 }
   0xe   : > { %s3837_s8 = scalar_select %p2897_p6, 1, 0 }
   0xf   : > { %p2583_p9 = scmp.eq.s32.totalorder %s2876_s25, 0  ;;  %p2904_p10 = pnand %p2332_p7, %p191_p8 }
  0x10   : > { %s2811_s10 = smov [#allocation3]  }
  0x11   : > { %s203_s11 = sshll.u32 %s2811_s10, 4  ;;  %p2572_p11 = pneg %p2904_p10  ;;  %s204_s11 = int_to_ptr.vmem [resolvable:$true] %s203_s11 }
  0x12   : > { %s2700_s12 = scalar_lea.vmem %s204_s11, 4608  ;;  %p2708_p3 = scmp.lt.s32.totalorder %s204_s11, %s204_s11 }
  0x13   : > { %p2573_p12 = pnand %p2583_p9, %p2572_p11  ;;  %p2701_p0 = scmp.ne.s32.totalorder %s204_s11, %s2700_s12 }
  0x14   : > { %p2709_p4 = scmp.lt.s32.totalorder %s2700_s12, %s2700_s12 }
  0x15   : > { %p2691_p13 = pneg %p2573_p12 }
  0x16   : > { %p2710_p6 = por %p2709_p4, %p2708_p3 }
  0x17   : > { %p2703_p1 = pnand %p2701_p0, %p2691_p13 }
  0x19   : > { %p2704_p2 = pneg %p2703_p1 }
  0x1b   : > { %p2711_p7 = pnand %p2710_p6, %p2704_p2 }
  0x1d   : > { %2714 = shalt.err (!%p2711_p7)
}
  0x1e   : > { %s2812_s13 = smov 64   ;;  %s2813_s14 = smov 4  }
  0x1f   : > { %2575 = dma.hbm_to_vmem [thread:$0]  (!%p2573_p12), %s3817_s1, 4608, %s204_s11, [#allocation4], %s2812_s13, %s2812_s13, %s2813_s14  }
  0x20   : > { %236 = sbr.rel (%p2904_p10) target bundleno = 669 (0x29d), region = 40 }
  0x25   : > { %2784 = dma.done.wait (%p2583_p9), [#allocation4], 4608  }
  0x26   : > { %2786 = vsyncadd (%p2583_p9), [#allocation4], 4294962688  ;;  %v2814_v0 = vmov 0   ;;  %v279_v1 = vld [vmem:[%s3819_s3 + $0x8] sm:$0xf]  ;;  %p271_p6 = scmp.lt.s32.totalorder %s2876_s25, 1  ;;  %v310_v32 = vlaneseq }
  0x27   : > { %2626 = vset.pattern.permute.xlu1 %v2814_v0  ;;  %2625 = vset.pattern.permute.xlu0 %v2814_v0  ;;  %v277_v2 = vld [vmem:[%s3819_s3] sm:$0xf]  ;;  %v280_v3 = vld [vmem:[%s3819_s3 + $0xc] sm:$0xf]  ;;  %v278_v4 = vld [vmem:[%s3819_s3 + $0x4] sm:$0xf] }
  0x28   : > { %328 = vperm.xlu1 %2626, %v279_v1   ;;  %304 = vperm.xlu0 %2625, %v277_v2   ;;  %v286_v5 = vld [vmem:[%s3820_s4 + $0x4] sm:$0xf]  ;;  %v285_v6 = vld [vmem:[%s3820_s4] sm:$0xf]  ;;  %v287_v7 = vld [vmem:[%s3820_s4 + $0x8] sm:$0xf] }
  0x29   : > { %v281_v8 = vld [vmem:[%s3819_s3 + $0x10] sm:$0xf]  ;;  %v288_v9 = vld [vmem:[%s3820_s4 + $0xc] sm:$0xf]  ;;  %v282_v10 = vld [vmem:[%s3819_s3 + $0x14] sm:$0xf] }
  0x2a   : > { %s272_s28 = scalar_select %p271_p6, %s2876_s25, 1  ;;  %v289_v11 = vld [vmem:[%s3820_s4 + $0x10] sm:$0xf]  ;;  %v283_v12 = vld [vmem:[%s3819_s3 + $0x18] sm:$0xf]  ;;  %v311_v34 = vshrl.u32 %v310_v32, 7 }
  0x2b   : > { %v284_v13 = vld [vmem:[%s3819_s3 + $0x1c] sm:$0xf]  ;;  %v290_v14 = vld [vmem:[%s3820_s4 + $0x14] sm:$0xf]  ;;  %v291_v16 = vld [vmem:[%s3820_s4 + $0x18] sm:$0xf] }
  0x2c   : > { %340 = vperm.xlu1 %2626, %v280_v3   ;;  %316 = vperm.xlu0 %2625, %v278_v4   ;;  %s2563_s14 = smul.u32 48, %s272_s28  ;;  %v292_v15 = vld [vmem:[%s3820_s4 + $0x1c] sm:$0xf]  ;;  %s2815_s28 = smov 64   ;;  %v2816_v30 = vmov 839922192  }
  0x2d   : > { %v308_v31 = vunpack.c.l.s4 %v2816_v30  ;;  %v2627_v36 = vld [vmem:[#allocation3 + $0x78] sm:$0xff]   ;;  %v2631_v42 = vld [vmem:[#allocation3 + $0x70] sm:$0xff]   ;;  %v2635_v52 = vld [vmem:[#allocation3 + $0x68] sm:$0xff]   ;;  %vm398_vm0 = vsmask.f32 3328  ;;  %vm585_vm6 = vcmask 519168  }
  0x2e   : > { %s2974_s9 = scalar_lea.vmem %s3816_s0, %s2563_s14  ;;  %v2628_v37 = vld [vmem:[#allocation3 + $0x38] sm:$0xff]   ;;  %2451 = vmatprep.subr.bf16.mxu0 %v2627_v36  ;;  %v2633_v45 = vld [vmem:[#allocation3 + $0xf0] sm:$0xff]   ;;  %v2637_v57 = vld [vmem:[#allocation3 + $0xe8] sm:$0xff]   ;;  %vm399_vm1 = vsmask.f32 7440  ;;  %vm634_vm7 = vcmask 1043968  }
  0x2f   : > { %v595_v17 = vld [vmem:[%s2974_s9 + $0x8] sm:$0xf]  ;;  %v594_v18 = vld [vmem:[%s2974_s9 + $0x4] sm:$0xf]  ;;  %v597_v19 = vld [vmem:[%s2974_s9 + $0x10] sm:$0xf]  ;;  %v309_v33 = vunpack.c.0.s8 %v308_v31  ;;  %2452 = vmatpush3.bf16.msra.mxu0 %v2628_v37 }
  0x30   : > { %666 = vperm.xlu1 %2626, %v286_v5   ;;  %654 = vperm.xlu0 %2625, %v285_v6   ;;  %v596_v20 = vld [vmem:[%s2974_s9 + $0xc] sm:$0xf]  ;;  %v1324_v21 = vld [vmem:[%s2974_s9 + $0x10] sm:$0xf]  ;;  %v599_v23 = vld [vmem:[%s2974_s9 + $0x18] sm:$0xf] }
  0x31   : > { %v1323_v22 = vld [vmem:[%s2974_s9 + $0xc] sm:$0xf]  ;;  %v598_v24 = vld [vmem:[%s2974_s9 + $0x14] sm:$0xf]  ;;  %v1326_v25 = vld [vmem:[%s2974_s9 + $0x18] sm:$0xf]  ;;  %v3002_v35 = vsub.s32 %v309_v33, %v311_v34  ;;  %2453 = vmatprep.subr.bf16.mxu0 %v2631_v42 }
  0x32   : > { %v1325_v26 = vld [vmem:[%s2974_s9 + $0x14] sm:$0xf]  ;;  %v601_v27 = vld [vmem:[%s2974_s9 + $0x20] sm:$0xf]  ;;  %v600_v28 = vld [vmem:[%s2974_s9 + $0x1c] sm:$0xf] }
  0x33   : > { %v1328_v29 = vld [vmem:[%s2974_s9 + $0x20] sm:$0xf]  ;;  %v2629_v38 = vld [vmem:[#allocation3 + $0xf8] sm:$0xff]   ;;  %v2632_v46 = vld [vmem:[#allocation3 + $0x30] sm:$0xff]   ;;  %vm498_vm3 = vsmask.f32 256 }
  0x34   : > { %678 = vperm.xlu1 %2626, %v287_v7   ;;  %352 = vperm.xlu0 %2625, %v281_v8   ;;  %v2630_v41 = vld [vmem:[#allocation3 + $0xb8] sm:$0xff]   ;;  %v2634_v47 = vld [vmem:[#allocation3 + $0xb0] sm:$0xff]   ;;  %v293_v53 = vld [vmem:[%s2974_s9] sm:$0x8]  ;;  %vm499_vm4 = vsmask.f32 4368 }
  0x35   : > { %2491 = vmatprep.subr.bf16.mxu1 %v2629_v38  ;;  %v1213_v54 = vld [vmem:[%s2974_s9 + $0x8] sm:$0x8]  ;;  %2454 = vmatpush3.bf16.msra.mxu0 %v2632_v46  ;;  %v2639_v6 = vld [vmem:[#allocation3 + $0x60] sm:$0xff]   ;;  %v296_v8 = vld [vmem:[%s2974_s9 + $0xc] sm:$0xf]  ;;  %vm1908_vm8 = vcmask 523264  }
  0x36   : > { %2492 = vmatpush3.bf16.msra.mxu1 %v2630_v41  ;;  %v2636_v0 = vld [vmem:[#allocation3 + $0x28] sm:$0xff]   ;;  %2455 = vmatprep.subr.bf16.mxu0 %v2635_v52  ;;  %v2641_v7 = vld [vmem:[#allocation3 + $0xe0] sm:$0xff]   ;;  %vm3027_vm2 = vmor %vm398_vm0, %vm399_vm1  ;;  %s3732_s12 = sand.u32 1, %s2801_s22   ;;  %s2427_s16 = sshll.u32 %s2876_s25, 9 }
  0x37   : > { %2493 = vmatprep.subr.bf16.mxu1 %v2633_v45  ;;  %v2638_v1 = vld [vmem:[#allocation3 + $0xa8] sm:$0xff]   ;;  %v1215_v45 = vld [vmem:[%s2974_s9 + $0x10] sm:$0xf]  ;;  %vm3107_vm5 = vmor %vm498_vm3, %vm499_vm4  ;;  %s2337_s13 = sshll.u32 %s3732_s12, 5  ;;  %s3747_s19 = scalar_lea.hbm %s3821_s5, %s2427_s16 }
  0x38   : > { %690 = vperm.xlu1 %2626, %v288_v9   ;;  %364 = vperm.xlu0 %2625, %v282_v10   ;;  %v940_v9 = vld [vmem:[%s2974_s9 + $0x10] sm:$0xf]  ;;  %v1216_v10 = vld [vmem:[%s2974_s9 + $0x14] sm:$0xf]  ;;  %v938_v30 = vld [vmem:[%s2974_s9 + $0x8] sm:$0xf] }
  0x39   : > { %2456 = vmatpush3.bf16.msra.mxu0 %v2636_v0  ;;  %v1214_v31 = vld [vmem:[%s2974_s9 + $0xc] sm:$0xf]  ;;  %s3735_s14 = scalar_lea.vmem [#allocation6], %s2337_s13  ;;  %s2194_s20 = scalar_lea.sflag [#allocation5], %s3732_s12 }
  0x3a   : > { %2494 = vmatpush3.bf16.msra.mxu1 %v2634_v47  ;;  %2457 = vmatprep.subr.bf16.mxu0 %v2639_v6  ;;  %s2212_s15 = sshll.u32 %s3735_s14, 4  ;;  %s2817_s29 = smov [#allocation6]   ;;  %s3741_s15 = int_to_ptr.vmem [resolvable:$true] %s2212_s15 }
  0x3b   : > { %2495 = vmatprep.subr.bf16.mxu1 %v2637_v57  ;;  %s2715_s26 = scalar_lea.vmem %s3741_s15, 512 }
  0x3c   : > { %702 = vperm.xlu1 %2626, %v289_v11   ;;  %376 = vperm.xlu0 %2625, %v283_v12   ;;  %p2716_p8 = scmp.ne.s32.totalorder %s3741_s15, %s2715_s26 }
  0x3e   : > { %2496 = vmatpush3.bf16.msra.mxu1 %v2638_v1  ;;  %p2717_p9 = pnand %p2716_p8, %p2893_p5 }
  0x3f   : > { %2497 = vmatprep.subr.bf16.mxu1 %v2641_v7  ;;  %v943_v7 = vld [vmem:[%s2974_s9 + $0x1c] sm:$0xf] }
  0x40   : > { %388 = vperm.xlu1 %2626, %v284_v13   ;;  %714 = vperm.xlu0 %2625, %v290_v14   ;;  %p2718_p10 = pneg %p2717_p9 }
  0x44   : > { %738 = vperm.xlu1 %2626, %v292_v15   ;;  %726 = vperm.xlu0 %2625, %v291_v16  }
  0x48   : > { %612 = vrot.lane.b32.xlu1 %v595_v17, %s2815_s28  ;;  %610 = vrot.lane.b32.xlu0 %v594_v18, %s2815_s28 }
  0x4c   : > { %616 = vrot.lane.b32.xlu1 %v597_v19, %s2815_s28  ;;  %614 = vrot.lane.b32.xlu0 %v596_v20, %s2815_s28 }
  0x50   : > { %1341 = vrot.lane.b32.xlu1 %v1324_v21, %s2815_s28  ;;  %1339 = vrot.lane.b32.xlu0 %v1323_v22, %s2815_s28  ;;  %v294_v22 = vld [vmem:[%s2974_s9 + $0x4] sm:$0xf] }
  0x54   : > { %620 = vrot.lane.b32.xlu1 %v599_v23, %s2815_s28  ;;  %618 = vrot.lane.b32.xlu0 %v598_v24, %s2815_s28 }
  0x58   : > { %1345 = vrot.lane.b32.xlu1 %v1326_v25, %s2815_s28  ;;  %1343 = vrot.lane.b32.xlu0 %v1325_v26, %s2815_s28 }
  0x5c   : > { %624 = vrot.lane.b32.xlu1 %v601_v27, %s2815_s28  ;;  %622 = vrot.lane.b32.xlu0 %v600_v28, %s2815_s28  ;;  %v2640_v27 = vld [vmem:[#allocation3 + $0x20] sm:$0xff]  }
  0x5d   : > { %2458 = vmatpush3.bf16.msra.mxu0 %v2640_v27  ;;  %v644_v27 = vld [vmem:[%s2974_s9 + $0x8] sm:$0xf] }
  0x60   : > { %1349 = vrot.lane.b32.xlu1 %v1328_v29, %s2815_s28 }
  0xa3   : > { %v329_v39 = vpop.permute.xlu1 %328  ;;  %v305_v40 = vpop.permute.xlu0 %304 }
  0xa4   : > { %v337_v43 = vrot.slane %v329_v39, %v3002_v35  ;;  %v313_v44 = vrot.slane %v305_v40, %v3002_v35 }
  0xa6   : > { %v421_v48 = vshll.u32 %v337_v43, 16  ;;  %v425_v49 = vshrl.u32 %v337_v43, 16  ;;  %v402_v50 = vshll.u32 %v313_v44, 16  ;;  %v405_v51 = vshrl.u32 %v313_v44, 16  ;;  %v295_v44 = vld [vmem:[%s2974_s9 + $0x8] sm:$0xf] }
  0xa7   : > { %v341_v55 = vpop.permute.xlu1 %340  ;;  %v317_v56 = vpop.permute.xlu0 %316 }
  0xa8   : > { %v3008_v58 = vrot.slane %v421_v48, 5  ;;  %v427_v59 = vrot.slane %v425_v49, 4  ;;  %v3010_v60 = vrot.slane %v402_v50, 5  ;;  %v407_v61 = vrot.slane %v405_v51, 4 }
  0xa9   : > { %v349_v62 = vrot.slane %v341_v55, %v3002_v35  ;;  %v325_v63 = vrot.slane %v317_v56, %v3002_v35 }
  0xaa   : > { %v428_v2 = vor.u32 %v427_v59, %v3008_v58  ;;  %v408_v3 = vor.u32 %v407_v61, %v3010_v60  ;;  %v489_v4 = vmul.bf16 %v3010_v60, %v293_v53  ;;  %v1222_v5 = vmul.bf16 %v1213_v54, %v3010_v60 }
  0xab   : > { %v431_v11 = vshll.u32 %v349_v62, 16  ;;  %v435_v12 = vshrl.u32 %v349_v62, 16  ;;  %v411_v13 = vshll.u32 %v325_v63, 16  ;;  %v415_v14 = vshrl.u32 %v325_v63, 16  ;;  %v667_v15 = vpop.permute.xlu1 %666  ;;  %v655_v16 = vpop.permute.xlu0 %654 }
  0xac   : > { %v429_v17 = vrot.slane %v428_v2, 4  ;;  %v409_v18 = vrot.slane %v408_v3, 4  ;;  %v3021_v19 = vshrl.u32 %v489_v4, 16  ;;  %v3023_v20 = vshrl.u32 %v1222_v5, 16 }
  0xad   : > { %v433_v23 = vrot.slane %v431_v11, 5  ;;  %v437_v24 = vrot.slane %v435_v12, 4  ;;  %v413_v25 = vrot.slane %v411_v13, 5  ;;  %v417_v26 = vrot.slane %v415_v14, 4 }
  0xae   : > { %v675_v32 = vrot.slane %v667_v15, %v3002_v35  ;;  %v3038_v33 = vrot.slane %v655_v16, %v3002_v35 }
  0xaf   : > { %v434_v34 = vsel %vm3027_vm2, %v429_v17, %v433_v23  ;;  %v438_v36 = vor.u32 %v437_v24, %v433_v23  ;;  %v414_v37 = vsel %vm3027_vm2, %v409_v18, %v413_v25  ;;  %v418_v38 = vor.u32 %v417_v26, %v413_v25  ;;  %v679_v49 = vpop.permute.xlu1 %678  ;;  %v353_v0 = vpop.permute.xlu0 %352  ;;  %v643_v18 = vld [vmem:[%s2974_s9 + $0x4] sm:$0xf] }
  0xb0   : > { %v492_v39 = vmul.bf16 %v434_v34, %v296_v8  ;;  %v3044_v40 = vmul.bf16 %v940_v9, %v434_v34  ;;  %v1225_v41 = vmul.bf16 %v1216_v10, %v434_v34  ;;  %v490_v42 = vmul.bf16 %v414_v37, %v294_v22 }
  0xb1   : > { %v3046_v43 = vrot.slane %v438_v36, 4  ;;  %v419_v46 = vrot.slane %v418_v38, 4  ;;  %v3050_v47 = vmul.bf16 %v938_v30, %v414_v37  ;;  %v1223_v48 = vmul.bf16 %v1214_v31, %v414_v37  ;;  %v1079_v30 = vld [vmem:[%s2974_s9 + $0x8] sm:$0xf]  ;;  %v1371_v36 = vld [vmem:[%s2974_s9 + $0xc] sm:$0xf] }
  0xb2   : > { %v525_v50 = vshrl.u32 %v492_v39, 16  ;;  %v528_v51 = vshll.u32 %v492_v39, 16  ;;  %v1255_v52 = vshrl.u32 %v1225_v41, 16  ;;  %v1258_v53 = vshll.u32 %v1225_v41, 16 }
  0xb3   : > { %v3055_v54 = vsel %vm3027_vm2, %v419_v46, %v3008_v58  ;;  %v507_v55 = vshrl.u32 %v490_v42, 16  ;;  %v510_v56 = vshll.u32 %v490_v42, 16  ;;  %v1237_v57 = vshrl.u32 %v1223_v48, 16  ;;  %v691_v12 = vpop.permute.xlu1 %690  ;;  %v365_v34 = vpop.permute.xlu0 %364  ;;  %v1372_v42 = vld [vmem:[%s2974_s9 + $0x10] sm:$0xf] }
  0xb4   : > { %v3057_v59 = vrot.slane %v525_v50, 7  ;;  %v3059_v61 = vrot.slane %v1255_v52, 7  ;;  %v3062_v62 = vmul.bf16 %v3055_v54, %v295_v44  ;;  %v3065_v63 = vmul.bf16 %v1215_v45, %v3055_v54 }
  0xb5   : > { %v3067_v1 = vrot.slane %v507_v55, 7  ;;  %v3069_v2 = vrot.slane %v1237_v57, 7  ;;  %v1240_v58 = vshll.u32 %v1223_v48, 16  ;;  %v757_v3 = vshrl.u32 %v675_v32, 16 }
  0xb6   : > { %v3072_v4 = vor.u32 %v528_v51, %v3057_v59  ;;  %v3075_v5 = vor.u32 %v1258_v53, %v3059_v61  ;;  %v516_v6 = vshrl.u32 %v3062_v62, 16  ;;  %v1246_v10 = vshrl.u32 %v3065_v63, 16 }
  0xb7   : > { %v3080_v8 = vor.u32 %v510_v56, %v3067_v1  ;;  %v3083_v9 = vor.u32 %v1240_v58, %v3069_v2  ;;  %v3089_v14 = vrot.slane %v757_v3, 7  ;;  %v760_v15 = vshll.u32 %v675_v32, 16 }
  0xb8   : > { %3841 = vst [vmem:[#allocation12_spill] sm:$0xff] %v3075_v5  ;;  %v3087_v13 = vrot.slane %v516_v6, 7  ;;  %v749_v16 = vshrl.u32 %v3038_v33, 16  ;;  %v3092_v17 = vrot.slane %v1246_v10, 7  ;;  %v752_v22 = vshll.u32 %v3038_v33, 16 }
  0xb9   : > { %v687_v23 = vrot.slane %v679_v49, %v3002_v35  ;;  %v361_v24 = vrot.slane %v353_v0, %v3002_v35  ;;  %v762_v25 = vor.u32 %v760_v15, %v3089_v14  ;;  %v764_v26 = vrot.slane %v3089_v14, 4  ;;  %v300_v5 = vld [vmem:[%s2974_s9 + $0x1c] sm:$0xf] }
  0xba   : > { %v751_v31 = vrot.slane %v749_v16, 7  ;;  %v3103_v32 = vrot.slane %v691_v12, %v3002_v35  ;;  %v3118_v52 = vrot.slane %v365_v34, %v3002_v35  ;;  %v645_v16 = vld [vmem:[%s2974_s9 + $0xc] sm:$0xf] }
  0xbb   : > { %v766_v37 = vshrl.u32 %v687_v23, 16  ;;  %v769_v38 = vshll.u32 %v687_v23, 16  ;;  %v441_v39 = vshll.u32 %v361_v24, 16  ;;  %v445_v41 = vshrl.u32 %v361_v24, 16 }
  0xbc   : > { %v754_v44 = vor.u32 %v752_v22, %v751_v31  ;;  %v755_v45 = vrot.slane %v751_v31, 4  ;;  %v775_v46 = vshrl.u32 %v3103_v32, 16  ;;  %v778_v48 = vshll.u32 %v3103_v32, 16 }
  0xbd   : > { %v3115_v49 = vrot.slane %v766_v37, 7  ;;  %v443_v50 = vrot.slane %v441_v39, 5  ;;  %v447_v51 = vrot.slane %v445_v41, 4 }
  0xbe   : > { %v3122_v53 = vsel %vm3107_vm5, %v755_v45, %v762_v25  ;;  %v828_v55 = vmul.bf16 %v754_v44, %v643_v18  ;;  %v3124_v56 = vmul.bf16 %v1079_v30, %v754_v44  ;;  %v1380_v57 = vmul.bf16 %v1371_v36, %v754_v44  ;;  %v1373_v25 = vld [vmem:[%s2974_s9 + $0x14] sm:$0xf]  ;;  %v297_v36 = vld [vmem:[%s2974_s9 + $0x10] sm:$0xf] }
  0xbf   : > { %v829_v0 = vmul.bf16 %v3122_v53, %v644_v27  ;;  %v1381_v58 = vmul.bf16 %v1372_v42, %v3122_v53  ;;  %v771_v3 = vor.u32 %v769_v38, %v3115_v49  ;;  %v773_v6 = vrot.slane %v3115_v49, 4  ;;  %v941_v42 = vld [vmem:[%s2974_s9 + $0x14] sm:$0xf] }
  0xc0   : > { %v838_v10 = vshrl.u32 %v828_v55, 16  ;;  %v841_v12 = vshll.u32 %v828_v55, 16  ;;  %v1390_v14 = vshrl.u32 %v1380_v57, 16  ;;  %v1393_v15 = vshll.u32 %v1380_v57, 16 }
  0xc1   : > { %v847_v18 = vshll.u32 %v829_v0, 16  ;;  %v851_v22 = vshrl.u32 %v829_v0, 16  ;;  %v1399_v23 = vshll.u32 %v1381_v58, 16  ;;  %v1403_v24 = vshrl.u32 %v1381_v58, 16 }
  0xc2   : > { %v840_v27 = vrot.slane %v838_v10, 4  ;;  %v843_v30 = vrot.slane %v841_v12, 5  ;;  %v1392_v31 = vrot.slane %v1390_v14, 4  ;;  %v1395_v34 = vrot.slane %v1393_v15, 5 }
  0xc3   : > { %v3133_v37 = vrot.slane %v847_v18, 5  ;;  %v3135_v38 = vrot.slane %v851_v22, 4  ;;  %v1401_v39 = vrot.slane %v1399_v23, 5  ;;  %v1405_v41 = vrot.slane %v1403_v24, 4 }
  0xc4   : > { %v844_v44 = vor.u32 %v843_v30, %v840_v27  ;;  %v1396_v45 = vor.u32 %v1395_v34, %v1392_v31  ;;  %v3140_v55 = vsel %vm3107_vm5, %v764_v26, %v771_v3  ;;  %v444_v57 = vsel %vm3027_vm2, %v3046_v43, %v443_v50  ;;  %v1217_v27 = vld [vmem:[%s2974_s9 + $0x18] sm:$0xf] }
  0xc5   : > { %3844 = vst [vmem:[#allocation13_spill] sm:$0xff] %v3133_v37  ;;  %3845 = vst [vmem:[#allocation14_spill] sm:$0xff] %v3135_v38  ;;  %v1406_v0 = vor.u32 %v1405_v41, %v1401_v39  ;;  %v830_v58 = vmul.bf16 %v3140_v55, %v645_v16  ;;  %v1382_v10 = vmul.bf16 %v1373_v25, %v3140_v55  ;;  %v703_v25 = vpop.permute.xlu1 %702  ;;  %v301_v38 = vld [vmem:[%s2974_s9 + $0x20] sm:$0xf] }
  0xc6   : > { %v448_v12 = vor.u32 %v447_v51, %v443_v50  ;;  %v3147_v14 = vrot.slane %v844_v44, 4  ;;  %v1397_v15 = vrot.slane %v1396_v45, 4  ;;  %v493_v18 = vmul.bf16 %v444_v57, %v297_v36 }
  0xc7   : > { %v3149_v22 = vmul.bf16 %v941_v42, %v444_v57  ;;  %v1407_v23 = vrot.slane %v1406_v0, 4  ;;  %v857_v24 = vshll.u32 %v830_v58, 16  ;;  %v861_v26 = vshrl.u32 %v830_v58, 16  ;;  %v298_v0 = vld [vmem:[%s2974_s9 + $0x14] sm:$0xf] }
  0xc8   : > { %3846 = vst [vmem:[#allocation15_spill] sm:$0xff] %v3147_v14  ;;  %v1409_v3 = vshll.u32 %v1382_v10, 16  ;;  %v1402_v43 = vsel %vm3027_vm2, %v1397_v15, %v1401_v39  ;;  %v1413_v30 = vshrl.u32 %v1382_v10, 16  ;;  %v449_v16 = vrot.slane %v448_v12, 4 }
  0xc9   : > { %v534_v31 = vshrl.u32 %v493_v18, 16  ;;  %1481 = vst.msk [vmem:[#allocation2 + $0x10] sm:$0xf] %vm585_vm6, %v1402_v43  ;;  %v3155_v50 = vrot.slane %v857_v24, 5  ;;  %v3157_v51 = vrot.slane %v861_v26, 4  ;;  %v537_v36 = vshll.u32 %v493_v18, 16  ;;  %v389_v28 = vpop.permute.xlu1 %388 }
  0xca   : > { %v1411_v34 = vrot.slane %v1409_v3, 5  ;;  %v1415_v41 = vrot.slane %v1413_v30, 4  ;;  %v1226_v44 = vmul.bf16 %v1217_v27, %v444_v57  ;;  %v3163_v39 = vrot.slane %v775_v46, 7  ;;  %v646_v24 = vld [vmem:[%s2974_s9 + $0x10] sm:$0xf]  ;;  %v377_v3 = vpop.permute.xlu0 %376 }
  0xcb   : > { %3847 = vst [vmem:[#allocation16_spill] sm:$0xff] %v3155_v50  ;;  %3848 = vst [vmem:[#allocation17_spill] sm:$0xff] %v3157_v51  ;;  %v3159_v42 = vrot.slane %v534_v31, 7  ;;  %v451_v58 = vshll.u32 %v3118_v52, 16  ;;  %v455_v10 = vshrl.u32 %v3118_v52, 16  ;;  %v711_v12 = vrot.slane %v703_v25, %v3002_v35 }
  0xcc   : > { %v1412_v45 = vsel %vm3027_vm2, %v1407_v23, %v1411_v34  ;;  %v1416_v15 = vor.u32 %v1415_v41, %v1411_v34  ;;  %v1264_v18 = vshrl.u32 %v1226_v44, 16  ;;  %v1267_v46 = vshll.u32 %v1226_v44, 16  ;;  %v942_v26 = vld [vmem:[%s2974_s9 + $0x18] sm:$0xf]  ;;  %v1218_v34 = vld [vmem:[%s2974_s9 + $0x1c] sm:$0xf] }
  0xcd   : > { %3849 = vst [vmem:[#allocation18_spill] sm:$0xff] %v3159_v42  ;;  %1482 = vst.msk [vmem:[#allocation2 + $0x24] sm:$0xf] %vm585_vm6, %v1412_v45  ;;  %v3173_v57 = vor.u32 %v537_v36, %v3159_v42  ;;  %v1374_v23 = vld [vmem:[%s2974_s9 + $0x18] sm:$0xf]  ;;  %v780_v27 = vor.u32 %v778_v48, %v3163_v39  ;;  %v782_v52 = vrot.slane %v3163_v39, 4  ;;  %v385_v39 = vrot.slane %v377_v3, %v3002_v35 }
  0xce   : > { %v453_v43 = vrot.slane %v451_v58, 5  ;;  %v457_v30 = vrot.slane %v455_v10, 4  ;;  %v1417_v31 = vrot.slane %v1416_v15, 4  ;;  %v3182_v25 = vrot.slane %v1264_v18, 7 }
  0xcf   : > { %v784_v36 = vshrl.u32 %v711_v12, 16  ;;  %v787_v41 = vshll.u32 %v711_v12, 16  ;;  %v3189_v44 = vsel %vm3107_vm5, %v773_v6, %v780_v27 }
  0xd0   : > { %3850 = vst [vmem:[#allocation19_spill] sm:$0xff] %v3182_v25  ;;  %v454_v32 = vsel %vm3027_vm2, %v449_v16, %v453_v43  ;;  %v458_v48 = vor.u32 %v457_v30, %v453_v43  ;;  %v3195_v45 = vor.u32 %v1267_v46, %v3182_v25  ;;  %v831_v58 = vmul.bf16 %v3189_v44, %v646_v24 }
  0xd1   : > { %v1383_v10 = vmul.bf16 %v1374_v23, %v3189_v44  ;;  %v494_v12 = vmul.bf16 %v454_v32, %v298_v0  ;;  %v3199_v49 = vmul.bf16 %v942_v26, %v454_v32  ;;  %v1227_v6 = vmul.bf16 %v1218_v34, %v454_v32  ;;  %v647_v26 = vld [vmem:[%s2974_s9 + $0x14] sm:$0xf]  ;;  %v1375_v32 = vld [vmem:[%s2974_s9 + $0x1c] sm:$0xf] }
  0xd2   : > { %3851 = vst [vmem:[#allocation20_spill] sm:$0xff] %v3195_v45  ;;  %v459_v15 = vrot.slane %v458_v48, 4  ;;  %v3201_v18 = vrot.slane %v784_v36, 7  ;;  %v867_v27 = vshll.u32 %v831_v58, 16  ;;  %v871_v16 = vshrl.u32 %v831_v58, 16 }
  0xd3   : > { %v1419_v43 = vshll.u32 %v1383_v10, 16  ;;  %v1423_v3 = vshrl.u32 %v1383_v10, 16  ;;  %v543_v30 = vshrl.u32 %v494_v12, 16  ;;  %v546_v46 = vshll.u32 %v494_v12, 16 }
  0xd4   : > { %v1273_v29 = vshrl.u32 %v1227_v6, 16  ;;  %v1276_v11 = vshll.u32 %v1227_v6, 16  ;;  %v3203_v24 = vrot.slane %v867_v27, 5  ;;  %v3205_v23 = vrot.slane %v871_v16, 4 }
  0xd5   : > { %v1421_v0 = vrot.slane %v1419_v43, 5  ;;  %v1425_v48 = vrot.slane %v1423_v3, 4  ;;  %v3208_v34 = vrot.slane %v543_v30, 7  ;;  %v789_v58 = vor.u32 %v787_v41, %v3201_v18  ;;  %v715_v43 = vpop.permute.xlu0 %714 }
  0xd6   : > { %3852 = vst [vmem:[#allocation21_spill] sm:$0xff] %v3203_v24  ;;  %3853 = vst [vmem:[#allocation22_spill] sm:$0xff] %v3205_v23  ;;  %v3210_v36 = vrot.slane %v1273_v29, 7  ;;  %v461_v27 = vshll.u32 %v385_v39, 16  ;;  %v465_v16 = vshrl.u32 %v385_v39, 16  ;;  %v397_v30 = vrot.slane %v389_v28, %v3002_v35 }
  0xd7   : > { %v1422_v12 = vsel %vm3027_vm2, %v1417_v31, %v1421_v0  ;;  %v1426_v6 = vor.u32 %v1425_v48, %v1421_v0  ;;  %v3219_v3 = vor.u32 %v546_v46, %v3208_v34  ;;  %v3226_v41 = vsel %vm3107_vm5, %v782_v52, %v789_v58  ;;  %v299_v48 = vld [vmem:[%s2974_s9 + $0x18] sm:$0xf] }
  0xd8   : > { %3854 = vst [vmem:[#allocation23_spill] sm:$0xff] %v3210_v36  ;;  %1483 = vst.msk [vmem:[#allocation2 + $0x38] sm:$0xf] %vm585_vm6, %v1422_v12  ;;  %v3222_v29 = vor.u32 %v1276_v11, %v3210_v36  ;;  %v832_v0 = vmul.bf16 %v3226_v41, %v647_v26  ;;  %v1384_v39 = vmul.bf16 %v1375_v32, %v3226_v41  ;;  %v463_v12 = vrot.slane %v461_v27, 5  ;;  %v2647_v36 = vld [vmem:[#allocation3 + $0x50] sm:$0xff]  }
  0xd9   : > { %3855 = vst [vmem:[#allocation24_spill] sm:$0xff] %v3219_v3  ;;  %v1427_v31 = vrot.slane %v1426_v6, 4  ;;  %v467_v46 = vrot.slane %v465_v16, 4  ;;  %v471_v10 = vshll.u32 %v397_v30, 16  ;;  %v475_v11 = vshrl.u32 %v397_v30, 16 }
  0xda   : > { %3856 = vst [vmem:[#allocation25_spill] sm:$0xff] %v3222_v29  ;;  %v3234_v51 = vrot.slane %v715_v43, %v3002_v35  ;;  %v877_v52 = vshll.u32 %v832_v0, 16  ;;  %v881_v58 = vshrl.u32 %v832_v0, 16  ;;  %v1429_v50 = vshll.u32 %v1384_v39, 16  ;;  %v1219_v6 = vld [vmem:[%s2974_s9 + $0x20] sm:$0xf] }
  0xdb   : > { %v1433_v28 = vshrl.u32 %v1384_v39, 16  ;;  %v464_v26 = vsel %vm3027_vm2, %v459_v15, %v463_v12  ;;  %v468_v32 = vor.u32 %v467_v46, %v463_v12  ;;  %v473_v27 = vrot.slane %v471_v10, 5  ;;  %v944_v0 = vld [vmem:[%s2974_s9 + $0x20] sm:$0xf]  ;;  %v1220_v15 = vld [vmem:[%s2974_s9 + $0x24] sm:$0xf] }
  0xdc   : > { %v477_v16 = vrot.slane %v475_v11, 4  ;;  %v3239_v29 = vrot.slane %v877_v52, 5  ;;  %v3241_v30 = vrot.slane %v881_v58, 4  ;;  %v1431_v43 = vrot.slane %v1429_v50, 5  ;;  %v945_v46 = vld [vmem:[%s2974_s9 + $0x24] sm:$0xf] }
  0xdd   : > { %v1435_v14 = vrot.slane %v1433_v28, 4  ;;  %v469_v25 = vrot.slane %v468_v32, 4  ;;  %v495_v39 = vmul.bf16 %v464_v26, %v299_v48  ;;  %v3245_v23 = vmul.bf16 %v943_v7, %v464_v26  ;;  %v1221_v7 = vld [vmem:[%s2974_s9 + $0x28] sm:$0xf] }
  0xde   : > { %3857 = vst [vmem:[#allocation26_spill] sm:$0xff] %v3239_v29  ;;  %3858 = vst [vmem:[#allocation27_spill] sm:$0xff] %v3241_v30  ;;  %v1228_v24 = vmul.bf16 %v1219_v6, %v464_v26  ;;  %v1432_v10 = vsel %vm3027_vm2, %v1427_v31, %v1431_v43  ;;  %v478_v11 = vor.u32 %v477_v16, %v473_v27  ;;  %v793_v52 = vshrl.u32 %v3234_v51, 16  ;;  %v939_v29 = vld [vmem:[%s2974_s9 + $0xc] sm:$0xf] }
  0xdf   : > { %v1436_v12 = vor.u32 %v1435_v14, %v1431_v43  ;;  %1484 = vst.msk [vmem:[#allocation2 + $0x4c] sm:$0xf] %vm585_vm6, %v1432_v10  ;;  %v552_v50 = vshrl.u32 %v495_v39, 16  ;;  %v555_v58 = vshll.u32 %v495_v39, 16  ;;  %v474_v6 = vsel %vm3027_vm2, %v469_v25, %v473_v27  ;;  %v1063_v3 = vld [vmem:[%s2974_s9 + $0x8] sm:$0xf] }
  0xe0   : > { %v1282_v28 = vshrl.u32 %v1228_v24, 16  ;;  %v1285_v48 = vshll.u32 %v1228_v24, 16  ;;  %v479_v26 = vrot.slane %v478_v11, 4  ;;  %v3259_v31 = vrot.slane %v793_v52, 7  ;;  %1071 = vst.msk [vmem:[#allocation2 + $0x8] sm:$0xf] %vm585_vm6, %v1063_v3 }
  0xe1   : > { %v3255_v32 = vrot.slane %v1436_v12, 4  ;;  %v3261_v14 = vrot.slane %v552_v50, 7  ;;  %v496_v43 = vmul.bf16 %v474_v6, %v300_v5  ;;  %v3265_v10 = vmul.bf16 %v944_v0, %v474_v6  ;;  %v2642_v50 = vld [vmem:[#allocation3 + $0xa0] sm:$0xff]   ;;  %v2643_v5 = vld [vmem:[#allocation3 + $0x58] sm:$0xff]  }
  0xe2   : > { %v3263_v16 = vrot.slane %v1282_v28, 7  ;;  %v497_v39 = vmul.bf16 %v479_v26, %v301_v38  ;;  %v3267_v30 = vmul.bf16 %v945_v46, %v479_v26  ;;  %v1229_v24 = vmul.bf16 %v1220_v15, %v474_v6  ;;  %v2644_v0 = vld [vmem:[#allocation3 + $0x18] sm:$0xff]   ;;  %2498 = vmatpush3.bf16.msra.mxu1 %v2642_v50  ;;  %2459 = vmatprep.subr.bf16.mxu0 %v2643_v5  ;;  %v1080_v5 = vld [vmem:[%s2974_s9 + $0xc] sm:$0xf] }
  0xe3   : > { %3859 = vst [vmem:[#allocation28_spill] sm:$0xff] %v3261_v14  ;;  %v1230_v12 = vmul.bf16 %v1221_v7, %v479_v26  ;;  %v3271_v25 = vor.u32 %v555_v58, %v3261_v14  ;;  %v561_v11 = vshrl.u32 %v496_v43, 16  ;;  %v564_v52 = vshll.u32 %v496_v43, 16  ;;  %v648_v58 = vld [vmem:[%s2974_s9 + $0x18] sm:$0xf]  ;;  %2460 = vmatpush3.bf16.msra.mxu0 %v2644_v0 }
  0xe4   : > { %3860 = vst [vmem:[#allocation29_spill] sm:$0xff] %v3263_v16  ;;  %v3274_v27 = vor.u32 %v1285_v48, %v3263_v16  ;;  %v570_v28 = vshrl.u32 %v497_v39, 16  ;;  %v573_v38 = vshll.u32 %v497_v39, 16  ;;  %v1291_v37 = vshrl.u32 %v1229_v24, 16  ;;  %2461 = vmatprep.subr.bf16.mxu0 %v2647_v36  ;;  %v649_v36 = vld [vmem:[%s2974_s9 + $0x1c] sm:$0xf] }
  0xe5   : > { %3861 = vst [vmem:[#allocation30_spill] sm:$0xff] %v3271_v25  ;;  %v1294_v46 = vshll.u32 %v1229_v24, 16  ;;  %v3277_v15 = vrot.slane %v561_v11, 7  ;;  %v1300_v7 = vshrl.u32 %v1230_v12, 16  ;;  %v1303_v6 = vshll.u32 %v1230_v12, 16  ;;  %v739_v11 = vpop.permute.xlu1 %738 }
  0xe6   : > { %3862 = vst [vmem:[#allocation31_spill] sm:$0xff] %v3274_v27  ;;  %v796_v48 = vshll.u32 %v3234_v51, 16  ;;  %v572_v26 = vrot.slane %v570_v28, 7  ;;  %v3282_v43 = vrot.slane %v1291_v37, 7  ;;  %v948_v24 = vmul.bf16 %v939_v29, %v3055_v54  ;;  %v1376_v27 = vld [vmem:[%s2974_s9 + $0x20] sm:$0xf] }
  0xe7   : > { %3863 = vst [vmem:[#allocation32_spill] sm:$0xff] %v3277_v15  ;;  %v3287_v16 = vor.u32 %v564_v52, %v3277_v15  ;;  %v1302_v12 = vrot.slane %v1300_v7, 7  ;;  %v961_v50 = vshrl.u32 %v3050_v47, 16  ;;  %v3869_v29 = vrot.slane %v3201_v18, 4 }
  0xe8   : > { %3864 = vst [vmem:[#allocation33_spill] sm:$0xff] %v3282_v43  ;;  %v798_v51 = vor.u32 %v796_v48, %v3259_v31  ;;  %v3293_v3 = vor.u32 %v573_v38, %v572_v26  ;;  %v3296_v37 = vor.u32 %v1294_v46, %v3282_v43  ;;  %v970_v28 = vshrl.u32 %v948_v24, 16  ;;  %v2645_v38 = vld [vmem:[#allocation3 + $0xd8] sm:$0xff]  }
  0xe9   : > { %3865 = vst [vmem:[#allocation34_spill] sm:$0xff] %v3287_v16  ;;  %v973_v39 = vshll.u32 %v948_v24, 16  ;;  %v3298_v54 = vor.u32 %v1303_v6, %v1302_v12  ;;  %v3306_v0 = vrot.slane %v961_v50, 7  ;;  %v747_v7 = vrot.slane %v739_v11, %v3002_v35  ;;  %2499 = vmatprep.subr.bf16.mxu1 %v2645_v38  ;;  %v2646_v38 = vld [vmem:[#allocation3 + $0x98] sm:$0xff]  }
  0xea   : > { %3866 = vst [vmem:[#allocation35_spill] sm:$0xff] %v3293_v3  ;;  %3867 = vst [vmem:[#allocation36_spill] sm:$0xff] %v3296_v37  ;;  %v3304_v52 = vsel %vm3107_vm5, %v3869_v29, %v798_v51  ;;  %v3311_v26 = vrot.slane %v970_v28, 7  ;;  %v3314_v6 = vmul.bf16 %v1080_v5, %v3122_v53  ;;  %v1098_v51 = vshrl.u32 %v3124_v56, 16  ;;  %v727_v5 = vpop.permute.xlu0 %726  ;;  %2500 = vmatpush3.bf16.msra.mxu1 %v2646_v38  ;;  %v2649_v38 = vld [vmem:[#allocation3 + $0xd0] sm:$0xff]  }
  0xeb   : > { %3868 = vst [vmem:[#allocation37_spill] sm:$0xff] %v3298_v54  ;;  %v833_v46 = vmul.bf16 %v3304_v52, %v648_v58  ;;  %v1385_v48 = vmul.bf16 %v1376_v27, %v3304_v52  ;;  %v968_v18 = vrot.slane %v3306_v0, 4  ;;  %v811_v24 = vshrl.u32 %v747_v7, 16  ;;  %v651_v54 = vld [vmem:[%s2974_s9 + $0x24] sm:$0x1]  ;;  %2501 = vmatprep.subr.bf16.mxu1 %v2649_v38  ;;  %v2650_v38 = vld [vmem:[#allocation3 + $0x90] sm:$0xff]  }
  0xec   : > { %v814_v12 = vshll.u32 %v747_v7, 16  ;;  %v975_v58 = vor.u32 %v973_v39, %v3311_v26  ;;  %v1379_v27 = vld [vmem:[%s2974_s9 + $0x2c] sm:$0x1]  ;;  %v1100_v43 = vrot.slane %v1098_v51, 4  ;;  %v1101_v53 = vshll.u32 %v3124_v56, 16  ;;  %v2648_v51 = vld [vmem:[#allocation3 + $0x10] sm:$0xff]  }
  0xed   : > { %v887_v50 = vshll.u32 %v833_v46, 16  ;;  %v891_v11 = vshrl.u32 %v833_v46, 16  ;;  %v1439_v29 = vshll.u32 %v1385_v48, 16  ;;  %v1443_v37 = vshrl.u32 %v1385_v48, 16  ;;  %2462 = vmatpush3.bf16.msra.mxu0 %v2648_v51  ;;  %v1064_v51 = vld [vmem:[%s2974_s9 + $0xc] sm:$0xf] }
  0xee   : > { %v813_v28 = vrot.slane %v811_v24, 7  ;;  %v976_v46 = vsel %vm3107_vm5, %v968_v18, %v975_v58  ;;  %v1103_v24 = vrot.slane %v1101_v53, 5  ;;  %1072 = vst.msk [vmem:[#allocation2 + $0x1c] sm:$0xf] %vm585_vm6, %v1064_v51  ;;  %v2652_v51 = vld [vmem:[#allocation3 + $0x8] sm:$0xff]   ;;  %2502 = vmatpush3.bf16.msra.mxu1 %v2650_v38 }
  0xef   : > { %v3322_v16 = vrot.slane %v887_v50, 5  ;;  %v3324_v3 = vrot.slane %v891_v11, 4  ;;  %v1441_v7 = vrot.slane %v1439_v29, 5  ;;  %v1445_v14 = vrot.slane %v1443_v37, 4  ;;  %1033 = vrot.lane.b32.xlu1 %v976_v46, %s2815_s28  ;;  %v650_v46 = vld [vmem:[%s2974_s9 + $0x20] sm:$0xf] }
  0xf0   : > { %v816_v48 = vor.u32 %v814_v12, %v813_v28  ;;  %v3328_v39 = vrot.slane %v813_v28, 4  ;;  %v1107_v37 = vshll.u32 %v3314_v6, 16  ;;  %v735_v11 = vrot.slane %v727_v5, %v3002_v35  ;;  %v1081_v5 = vld [vmem:[%s2974_s9 + $0x10] sm:$0xf] }
  0xf1   : > { %3870 = vst [vmem:[#allocation38_spill] sm:$0xff] %v3322_v16  ;;  %3871 = vst [vmem:[#allocation39_spill] sm:$0xff] %v3324_v3  ;;  %v1442_v56 = vsel %vm3027_vm2, %v3255_v32, %v1441_v7  ;;  %v1446_v50 = vor.u32 %v1445_v14, %v1441_v7  ;;  %v1104_v29 = vor.u32 %v1103_v24, %v1100_v43  ;;  %v979_v32 = vshrl.u32 %v3044_v40, 16  ;;  %v937_v14 = vld [vmem:[%s2974_s9 + $0x4] sm:$0x8]  ;;  %v2651_v16 = vld [vmem:[#allocation3 + $0x48] sm:$0xff]  }
  0xf2   : > { %1485 = vst.msk [vmem:[#allocation2 + $0x60] sm:$0xf] %vm585_vm6, %v1442_v56  ;;  %v836_v18 = vmul.bf16 %v3328_v39, %v651_v54  ;;  %v1388_v12 = vmul.bf16 %v1379_v27, %v3328_v39  ;;  %v3343_v28 = vrot.slane %v1107_v37, 5  ;;  %v802_v35 = vshrl.u32 %v735_v11, 16  ;;  %2463 = vmatprep.subr.bf16.mxu0 %v2651_v16 }
  0xf3   : > { %v3341_v58 = vrot.slane %v1446_v50, 4  ;;  %v805_v53 = vshll.u32 %v735_v11, 16  ;;  %v1105_v43 = vrot.slane %v1104_v29, 4  ;;  %v3350_v7 = vrot.slane %v979_v32, 7  ;;  %v1377_v29 = vld [vmem:[%s2974_s9 + $0x24] sm:$0xf]  ;;  %2464 = vmatpush3.bf16.msra.mxu0 %v2652_v51 }
  0xf4   : > { %v3346_v54 = vshll.u32 %v836_v18, 16  ;;  %v3348_v27 = vshll.u32 %v1388_v12, 16  ;;  %v804_v24 = vrot.slane %v802_v35, 7  ;;  %v988_v56 = vshrl.u32 %v3149_v22, 16  ;;  %v1066_v51 = vld [vmem:[%s2974_s9 + $0x14] sm:$0xf] }
  0xf5   : > { %v991_v50 = vshll.u32 %v3149_v22, 16  ;;  %v946_v37 = vmul.bf16 %v937_v14, %v3010_v60  ;;  %v1110_v12 = vsel %vm3027_vm2, %v1105_v43, %v3343_v28  ;;  %v986_v32 = vrot.slane %v3350_v7, 4  ;;  %v1378_v22 = vld [vmem:[%s2974_s9 + $0x28] sm:$0xf]  ;;  %1074 = vst.msk [vmem:[#allocation2 + $0x44] sm:$0xf] %vm585_vm6, %v1066_v51 }
  0xf6   : > { %3872 = vst [vmem:[#allocation40_spill] sm:$0xff] %v3346_v54  ;;  %1181 = vrot.lane.b32.xlu0 %v1110_v12, %s2815_s28  ;;  %v807_v35 = vor.u32 %v805_v53, %v804_v24  ;;  %v809_v60 = vrot.slane %v804_v24, 4  ;;  %v3368_v14 = vrot.slane %v988_v56, 7  ;;  %v964_v18 = vshll.u32 %v3050_v47, 16 }
  0xf7   : > { %v956_v11 = vshrl.u32 %v946_v37, 16  ;;  %v3372_v54 = vmul.bf16 %v1081_v5, %v3140_v55  ;;  %v1111_v43 = vshrl.u32 %v3314_v6, 16  ;;  %v997_v3 = vshrl.u32 %v3199_v49, 16  ;;  %v3387_v5 = vpop.permute.xlu1 %612  ;;  %v2653_v6 = vld [vmem:[#allocation3 + $0xc8] sm:$0xff]  }
  0xf8   : > { %v3873_v12 = vrot.slane %v3259_v31, 4  ;;  %v3384_v24 = vsel %vm3107_vm5, %v809_v60, %v816_v48  ;;  %v993_v47 = vor.u32 %v991_v50, %v3368_v14  ;;  %v966_v48 = vor.u32 %v964_v18, %v3306_v0  ;;  %2503 = vmatprep.subr.bf16.mxu1 %v2653_v6  ;;  %v3398_v0 = vpop.permute.xlu0 %610  ;;  %v2656_v18 = vld [vmem:[#allocation3] sm:$0xff]  }
  0xf9   : > { %v2341_v55 = vrot.slane %v956_v11, 11  ;;  %v835_v37 = vmul.bf16 %v3384_v24, %v650_v46  ;;  %v1387_v15 = vmul.bf16 %v1378_v22, %v3384_v24  ;;  %v1113_v60 = vrot.slane %v1111_v43, 4  ;;  %v2654_v46 = vld [vmem:[#allocation3 + $0x88] sm:$0xff]   ;;  %v2657_v43 = vld [vmem:[#allocation3 + $0xc0] sm:$0xff]  }
  0xfa   : > { %v3380_v53 = vsel %vm3107_vm5, %v3873_v12, %v807_v35  ;;  %v994_v35 = vsel %vm3107_vm5, %v986_v32, %v993_v47  ;;  %v1117_v50 = vshll.u32 %v3372_v54, 16  ;;  %2504 = vmatpush3.bf16.msra.mxu1 %v2654_v46  ;;  %v999_v46 = vrot.slane %v997_v3, 7 }
  0xfb   : > { %v834_v56 = vmul.bf16 %v3380_v53, %v649_v36  ;;  %v1386_v31 = vmul.bf16 %v1377_v29, %v3380_v53  ;;  %v907_v36 = vshll.u32 %v835_v37, 16  ;;  %v911_v42 = vshrl.u32 %v835_v37, 16  ;;  %1037 = vrot.lane.b32.xlu1 %v994_v35, %s2815_s28  ;;  %v2655_v29 = vld [vmem:[#allocation3 + $0x40] sm:$0xff]   ;;  %v3409_v25 = vpop.permute.xlu1 %616  ;;  %2505 = vmatprep.subr.bf16.mxu1 %v2657_v43  ;;  %v1083_v43 = vld [vmem:[%s2974_s9 + $0x18] sm:$0xf] }
  0xfc   : > { %v1459_v32 = vshll.u32 %v1387_v15, 16  ;;  %v1463_v47 = vshrl.u32 %v1387_v15, 16  ;;  %2465 = vmatprep.subr.bf16.mxu0 %v2655_v29  ;;  %v977_v3 = vrot.slane %v3311_v26, 4  ;;  %v3440_v26 = vmul.bf16 %v1083_v43, %v3226_v41 }
  0xfd   : > { %v897_v11 = vshll.u32 %v834_v56, 16  ;;  %v901_v12 = vshrl.u32 %v834_v56, 16  ;;  %v1449_v22 = vshll.u32 %v1386_v31, 16  ;;  %v1453_v38 = vshrl.u32 %v1386_v31, 16  ;;  %2466 = vmatpush3.bf16.msra.mxu0 %v2656_v18 }
  0xfe   : > { %v3404_v56 = vrot.slane %v907_v36, 5  ;;  %v3406_v37 = vrot.slane %v911_v42, 4  ;;  %v1461_v45 = vrot.slane %v1459_v32, 5  ;;  %v1465_v15 = vrot.slane %v1463_v47, 4  ;;  %v1327_v36 = vld [vmem:[%s2974_s9 + $0x1c] sm:$0xf] }
  0xff   : > { %v3400_v16 = vrot.slane %v897_v11, 5  ;;  %v3402_v6 = vrot.slane %v901_v12, 4  ;;  %v1451_v35 = vrot.slane %v1449_v22, 5  ;;  %v1455_v31 = vrot.slane %v1453_v38, 4  ;;  %v1082_v47 = vld [vmem:[%s2974_s9 + $0x14] sm:$0xf] }
 0x100   : > { %v967_v11 = vsel %vm3107_vm5, %v2341_v55, %v966_v48  ;;  %v1114_v42 = vor.u32 %v1113_v60, %v3343_v28  ;;  %v3415_v12 = vrot.slane %v1117_v50, 5  ;;  %v1466_v38 = vor.u32 %v1465_v15, %v1461_v45  ;;  %v2658_v60 = vld [vmem:[#allocation3 + $0x80] sm:$0xff]   ;;  %v3428_v50 = vld [vmem:[#allocation3 + $0x118] sm:$0xff]  }
 0x101   : > { %v1452_v29 = vsel %vm3027_vm2, %v3341_v58, %v1451_v35  ;;  %v1456_v22 = vor.u32 %v1455_v31, %v1451_v35  ;;  %1031 = vrot.lane.b32.xlu0 %v967_v11, %s2815_s28  ;;  %v1006_v32 = vshrl.u32 %v3245_v23, 16  ;;  %v1004_v55 = vrot.slane %v999_v46, 4  ;;  %v3433_v31 = vpop.permute.xlu0 %614  ;;  %2506 = vmatpush3.bf16.msra.mxu1 %v2658_v60  ;;  %v1068_v60 = vld [vmem:[%s2974_s9 + $0x1c] sm:$0xf] }
 0x102   : > { %1486 = vst.msk [vmem:[#allocation2 + $0x74] sm:$0xf] %vm585_vm6, %v1452_v29  ;;  %v1115_v28 = vrot.slane %v1114_v42, 4  ;;  %v1009_v48 = vshll.u32 %v3245_v23, 16  ;;  %v1467_v18 = vrot.slane %v1466_v38, 4  ;;  %v982_v35 = vshll.u32 %v3044_v40, 16  ;;  %2539 = vmatprep.subr.bf16.mxu0 %v3428_v50  ;;  %2555 = vmatprep.subr.bf16.mxu1 %v3428_v50 }
 0x103   : > { %v1457_v58 = vrot.slane %v1456_v22, 4  ;;  %v3430_v51 = vrot.slane %v1006_v32, 7  ;;  %v1091_v23 = vmul.bf16 %v1082_v47, %v3189_v44  ;;  %v995_v11 = vrot.slane %v3368_v14, 4  ;;  %v1084_v14 = vld [vmem:[%s2974_s9 + $0x1c] sm:$0xf]  ;;  %v3455_v22 = vpop.permute.xlu1 %1341 }
 0x104   : > { %v1120_v15 = vsel %vm3027_vm2, %v1115_v28, %v3415_v12  ;;  %v3874_v42 = vrot.slane %v3348_v27, 5  ;;  %v1000_v41 = vshll.u32 %v3199_v49, 16  ;;  %v1137_v32 = vshll.u32 %v3440_v26, 16  ;;  %1076 = vst.msk [vmem:[#allocation2 + $0x6c] sm:$0xf] %vm585_vm6, %v1068_v60 }
 0x105   : > { %v1462_v40 = vsel %vm3027_vm2, %v1457_v58, %v1461_v45  ;;  %1183 = vrot.lane.b32.xlu1 %v1120_v15, %s2815_s28  ;;  %1347 = vrot.lane.b32.xlu0 %v1327_v36, %s2815_s28  ;;  %v1011_v44 = vor.u32 %v1009_v48, %v3430_v51  ;;  %v984_v45 = vor.u32 %v982_v35, %v3350_v7  ;;  %v1127_v27 = vshll.u32 %v1091_v23, 16  ;;  %v1065_v36 = vld [vmem:[%s2974_s9 + $0x10] sm:$0xf]  ;;  %v1085_v48 = vld [vmem:[%s2974_s9 + $0x20] sm:$0xf] }
 0x106   : > { %v1472_v29 = vsel %vm3027_vm2, %v1467_v18, %v3874_v42  ;;  %1487 = vst.msk [vmem:[#allocation2 + $0x88] sm:$0xf] %vm585_vm6, %v1462_v40  ;;  %v1131_v38 = vshrl.u32 %v1091_v23, 16  ;;  %v1002_v47 = vor.u32 %v1000_v41, %v999_v46  ;;  %v1015_v43 = vshrl.u32 %v3265_v10, 16  ;;  %1073 = vst.msk [vmem:[#allocation2 + $0x30] sm:$0xf] %vm585_vm6, %v1065_v36 }
 0x107   : > { %1488 = vst.msk [vmem:[#allocation2 + $0x9c] sm:$0xf] %vm585_vm6, %v1472_v29  ;;  %v1012_v49 = vsel %vm3107_vm5, %v1004_v55, %v1011_v44  ;;  %v1024_v28 = vshrl.u32 %v3267_v30, 16  ;;  %v985_v7 = vsel %vm3107_vm5, %v977_v3, %v984_v45  ;;  %v1129_v58 = vrot.slane %v1127_v27, 5  ;;  %v3480_v3 = vpop.permute.xlu0 %1339  ;;  %v1086_v41 = vld [vmem:[%s2974_s9 + $0x24] sm:$0xf] }
 0x108   : > { %v1133_v18 = vrot.slane %v1131_v38, 4  ;;  %v3472_v35 = vrot.slane %v1137_v32, 5  ;;  %v1003_v46 = vsel %vm3107_vm5, %v995_v11, %v1002_v47  ;;  %v1017_v55 = vrot.slane %v1015_v43, 7  ;;  %v1070_v45 = vld [vmem:[%s2974_s9 + $0x24] sm:$0xf] }
 0x109   : > { %1041 = vrot.lane.b32.xlu1 %v1012_v49, %s2815_s28  ;;  %1035 = vrot.lane.b32.xlu0 %v985_v7, %s2815_s28  ;;  %v1026_v15 = vrot.slane %v1024_v28, 7  ;;  %v1027_v23 = vshll.u32 %v3267_v30, 16  ;;  %v1121_v42 = vshrl.u32 %v3372_v54, 16  ;;  %v1093_v29 = vmul.bf16 %v1084_v14, %v3304_v52  ;;  %v3489_v30 = vpop.permute.xlu1 %620  ;;  %1078 = vst.msk [vmem:[#allocation2 + $0x94] sm:$0xf] %vm585_vm6, %v1070_v45 }
 0x10a   : > { %v1134_v40 = vor.u32 %v1133_v18, %v1129_v58  ;;  %v1094_v44 = vmul.bf16 %v1085_v48, %v3380_v53  ;;  %v1022_v27 = vrot.slane %v1017_v55, 4  ;;  %v1013_v11 = vrot.slane %v3430_v51, 4  ;;  %v1087_v14 = vld [vmem:[%s2974_s9 + $0x28] sm:$0x1]  ;;  %v1067_v7 = vld [vmem:[%s2974_s9 + $0x18] sm:$0xf] }
 0x10b   : > { %v1029_v38 = vor.u32 %v1027_v23, %v1026_v15  ;;  %v1018_v32 = vshll.u32 %v3265_v10, 16  ;;  %v1123_v36 = vrot.slane %v1121_v42, 4  ;;  %v1147_v49 = vshll.u32 %v1093_v29, 16  ;;  %1075 = vst.msk [vmem:[#allocation2 + $0x58] sm:$0xf] %vm585_vm6, %v1067_v7 }
 0x10c   : > { %v1135_v54 = vrot.slane %v1134_v40, 4  ;;  %v1151_v52 = vshrl.u32 %v1093_v29, 16  ;;  %v1157_v47 = vshll.u32 %v1094_v44, 16  ;;  %v1095_v10 = vmul.bf16 %v1086_v41, %v3384_v24  ;;  %v3508_v24 = vpop.permute.xlu0 %618 }
 0x10d   : > { %1039 = vrot.lane.b32.xlu0 %v1003_v46, %s2815_s28  ;;  %v1030_v53 = vsel %vm3107_vm5, %v1022_v27, %v1029_v38  ;;  %v1020_v51 = vor.u32 %v1018_v32, %v1017_v55  ;;  %v1124_v28 = vor.u32 %v1123_v36, %v3415_v12  ;;  %v3501_v48 = vrot.slane %v1147_v49, 5  ;;  %v1346_v38 = vpop.permute.xlu1 %1345  ;;  %v1069_v36 = vld [vmem:[%s2974_s9 + $0x20] sm:$0xf] }
 0x10e   : > { %v1140_v43 = vsel %vm3027_vm2, %v1135_v54, %v3472_v35  ;;  %v1153_v60 = vrot.slane %v1151_v52, 4  ;;  %v1159_v18 = vrot.slane %v1157_v47, 5  ;;  %v1096_v55 = vmul.bf16 %v1087_v14, %v3328_v39  ;;  %1077 = vst.msk [vmem:[#allocation2 + $0x80] sm:$0xf] %vm585_vm6, %v1069_v36  ;;  %v3890_v36 = vld [vmem:[#allocation19_spill] sm:$0xff] }
 0x10f   : > { %1187 = vrot.lane.b32.xlu1 %v1140_v43, %s2815_s28  ;;  %v1021_v46 = vsel %vm3107_vm5, %v1013_v11, %v1020_v51  ;;  %v1167_v15 = vshll.u32 %v1095_v10, 16  ;;  %v1125_v23 = vrot.slane %v1124_v28, 4  ;;  %v1171_v40 = vshrl.u32 %v1095_v10, 16 }
 0x110   : > { %v1154_v12 = vor.u32 %v1153_v60, %v3501_v48  ;;  %v1141_v42 = vshrl.u32 %v3440_v26, 16  ;;  %v1177_v41 = vshll.u32 %v1096_v55, 16  ;;  %v1161_v45 = vshrl.u32 %v1094_v44, 16  ;;  %v3542_v28 = vpop.permute.xlu0 %1343  ;;  %v3881_v55 = vld [vmem:[#allocation18_spill] sm:$0xff] }
 0x111   : > { %v3513_v29 = vrot.slane %v1167_v15, 5  ;;  %v514_v27 = vrot.slane %v3067_v1, 4  ;;  %v1130_v39 = vsel %vm3027_vm2, %v1125_v23, %v1129_v58  ;;  %v1173_v32 = vrot.slane %v1171_v40, 4  ;;  %v3882_v23 = vld [vmem:[#allocation32_spill] sm:$0xff]  ;;  %v3883_v40 = vld [vmem:[#allocation23_spill] sm:$0xff] }
 0x112   : > { %v1155_v11 = vrot.slane %v1154_v12, 4  ;;  %v1143_v54 = vrot.slane %v1141_v42, 4  ;;  %1185 = vrot.lane.b32.xlu0 %v1130_v39, %s2815_s28  ;;  %v1179_v49 = vrot.slane %v1177_v41, 5  ;;  %v1163_v26 = vrot.slane %v1161_v45, 4 }
 0x113   : > { %1045 = vrot.lane.b32.xlu1 %v1030_v53, %s2815_s28  ;;  %v3875_v52 = vshll.u32 %v3062_v62, 16  ;;  %v532_v1 = vrot.slane %v3057_v59, 4  ;;  %v1174_v14 = vor.u32 %v1173_v32, %v3513_v29  ;;  %v3876_v53 = vrot.slane %v3021_v19, 11  ;;  %v3889_v32 = vld [vmem:[#allocation22_spill] sm:$0xff] }
 0x114   : > { %v1160_v58 = vsel %vm3027_vm2, %v1155_v11, %v1159_v18  ;;  %v1144_v47 = vor.u32 %v1143_v54, %v3472_v35  ;;  %v1164_v10 = vor.u32 %v1163_v26, %v1159_v18  ;;  %v1244_v43 = vrot.slane %v3069_v2, 4  ;;  %v625_v18 = vpop.permute.xlu1 %624  ;;  %v623_v45 = vpop.permute.xlu0 %622  ;;  %v3888_v11 = vld [vmem:[#allocation21_spill] sm:$0xff]  ;;  %v1330_v26 = vld [vmem:[%s2974_s9 + $0x28] sm:$0xf] }
 0x115   : > { %v521_v44 = vor.u32 %v3875_v52, %v3087_v13  ;;  %v513_v51 = vsel %vm3107_vm5, %v3876_v53, %v3080_v8  ;;  %v540_v59 = vsel %vm3107_vm5, %v532_v1, %v3173_v57  ;;  %v1175_v35 = vrot.slane %v1174_v14, 4  ;;  %v3891_v52 = vld [vmem:[#allocation35_spill] sm:$0xff]  ;;  %v3894_v14 = vld [vmem:[#allocation34_spill] sm:$0xff] }
 0x116   : > { %586 = vst.msk [vmem:[#allocation2] sm:$0xf] %vm585_vm6, %v513_v51  ;;  %v1145_v60 = vrot.slane %v1144_v47, 4  ;;  %589 = vst.msk [vmem:[#allocation2 + $0x3c] sm:$0xf] %vm585_vm6, %v540_v59  ;;  %v3877_v19 = vshll.u32 %v3065_v63, 16  ;;  %1043 = vrot.lane.b32.xlu0 %v1021_v46, %s2815_s28  ;;  %v874_v54 = vor.u32 %v3889_v32, %v3888_v11 }
 0x117   : > { %v522_v62 = vsel %vm3107_vm5, %v514_v27, %v521_v44  ;;  %635 = vst.msk [vmem:[#allocation2] sm:$0xf] %vm634_vm7, %v3398_v0  ;;  %v523_v57 = vrot.slane %v3087_v13, 4  ;;  %1191 = vrot.lane.b32.xlu1 %v1160_v58, %s2815_s28  ;;  %v3554_v2 = vrot.slane %v1164_v10, 4  ;;  %638 = vst.msk [vmem:[#allocation2 + $0x3c] sm:$0xf] %vm634_vm7, %v3409_v25  ;;  %v1180_v46 = vsel %vm3027_vm2, %v1175_v35, %v1179_v49 }
 0x118   : > { %587 = vst.msk [vmem:[#allocation2 + $0x14] sm:$0xf] %vm585_vm6, %v522_v62  ;;  %v1251_v8 = vor.u32 %v3877_v19, %v3092_v17  ;;  %v550_v0 = vrot.slane %v3208_v34, 4  ;;  %v3878_v63 = vrot.slane %v3023_v20, 11  ;;  %v1262_v7 = vrot.slane %v3059_v61, 4  ;;  %v3886_v27 = vld [vmem:[#allocation13_spill] sm:$0xff]  ;;  %v1350_v53 = vpop.permute.xlu1 %1349 }
 0x119   : > { %636 = vst.msk [vmem:[#allocation2 + $0x14] sm:$0xf] %vm634_vm7, %v3387_v5  ;;  %v1150_v5 = vsel %vm3027_vm2, %v1145_v60, %v3501_v48  ;;  %v531_v20 = vsel %vm3107_vm5, %v523_v57, %v3072_v4  ;;  %v1170_v61 = vsel %vm3027_vm2, %v3554_v2, %v3513_v29  ;;  %v3880_v48 = vld [vmem:[#allocation20_spill] sm:$0xff]  ;;  %v541_v15 = vrot.slane %v3881_v55, 4  ;;  %v3893_v1 = vld [vmem:[#allocation31_spill] sm:$0xff]  ;;  %v3897_v35 = vld [vmem:[#allocation38_spill] sm:$0xff] }
 0x11a   : > { %v1243_v13 = vsel %vm3107_vm5, %v3878_v63, %v3083_v9  ;;  %v1252_v25 = vsel %vm3107_vm5, %v1244_v43, %v1251_v8  ;;  %588 = vst.msk [vmem:[#allocation2 + $0x28] sm:$0xf] %vm585_vm6, %v531_v20  ;;  %v3879_v9 = vld [vmem:[#allocation30_spill] sm:$0xff]  ;;  %v1270_v4 = vsel %vm3107_vm5, %v1262_v7, %v3880_v48  ;;  %v568_v12 = vrot.slane %v3882_v23, 4  ;;  %v3884_v29 = vld [vmem:[#allocation28_spill] sm:$0xff]  ;;  %1189 = vrot.lane.b32.xlu0 %v1150_v5, %s2815_s28  ;;  %v3895_v62 = vld [vmem:[#allocation15_spill] sm:$0xff] }
 0x11b   : > { %1315 = vst.msk [vmem:[#allocation2 + $0xc] sm:$0xf] %vm585_vm6, %v1243_v13  ;;  %1316 = vst.msk [vmem:[#allocation2 + $0x20] sm:$0xf] %vm585_vm6, %v1252_v25  ;;  %v558_v34 = vsel %vm3107_vm5, %v550_v0, %v3879_v9  ;;  %v1280_v42 = vrot.slane %v3883_v40, 4  ;;  %v559_v41 = vrot.slane %v3884_v29, 4  ;;  %1195 = vrot.lane.b32.xlu1 %v1180_v46, %s2815_s28  ;;  %v850_v59 = vsel %vm3027_vm2, %v3895_v62, %v3886_v27 }
 0x11c   : > { %1363 = vst.msk [vmem:[#allocation2 + $0xc] sm:$0xf] %vm634_vm7, %v3480_v3  ;;  %1364 = vst.msk [vmem:[#allocation2 + $0x20] sm:$0xf] %vm634_vm7, %v3455_v22  ;;  %v1253_v3 = vrot.slane %v3092_v17, 4  ;;  %v3887_v17 = vld [vmem:[#allocation14_spill] sm:$0xff]  ;;  %v904_v46 = vor.u32 %v3402_v6, %v3400_v16 }
 0x11d   : > { %637 = vst.msk [vmem:[#allocation2 + $0x28] sm:$0xf] %vm634_vm7, %v3433_v31  ;;  %v3885_v31 = vld [vmem:[#allocation24_spill] sm:$0xff]  ;;  %v854_v39 = vor.u32 %v3887_v17, %v3886_v27  ;;  %v1271_v49 = vrot.slane %v3890_v36, 4  ;;  %v1288_v58 = vsel %vm3107_vm5, %v1280_v42, %v3893_v1  ;;  %v567_v47 = vsel %vm3107_vm5, %v559_v41, %v3894_v14  ;;  %v3896_v43 = vld [vmem:[#allocation25_spill] sm:$0xff]  ;;  %v3898_v60 = vld [vmem:[#allocation39_spill] sm:$0xff] }
 0x11e   : > { %591 = vst.msk [vmem:[#allocation2 + $0x64] sm:$0xf] %vm585_vm6, %v558_v34  ;;  %1318 = vst.msk [vmem:[#allocation2 + $0x48] sm:$0xf] %vm585_vm6, %v1270_v4  ;;  %v549_v22 = vsel %vm3107_vm5, %v541_v15, %v3885_v31  ;;  %v875_v10 = vrot.slane %v874_v54, 4  ;;  %v894_v19 = vor.u32 %v3898_v60, %v3897_v35  ;;  %v3899_v8 = vld [vmem:[#allocation16_spill] sm:$0xff]  ;;  %1193 = vrot.lane.b32.xlu0 %v1170_v61, %s2815_s28 }
 0x11f   : > { %640 = vst.msk [vmem:[#allocation2 + $0x64] sm:$0xf] %vm634_vm7, %v3489_v30  ;;  %1366 = vst.msk [vmem:[#allocation2 + $0x48] sm:$0xf] %vm634_vm7, %v1346_v38  ;;  %v576_v30 = vsel %vm3107_vm5, %v568_v12, %v3891_v52  ;;  %v3892_v38 = vld [vmem:[#allocation12_spill] sm:$0xff]  ;;  %v855_v51 = vrot.slane %v854_v39, 4  ;;  %1353 = vrot.lane.b32.xlu1 %v1330_v26, %s2815_s28 }
 0x120   : > { %590 = vst.msk [vmem:[#allocation2 + $0x50] sm:$0xf] %vm585_vm6, %v549_v22  ;;  %v1261_v44 = vsel %vm3107_vm5, %v1253_v3, %v3892_v38  ;;  %593 = vst.msk [vmem:[#allocation2 + $0x8c] sm:$0xf] %vm585_vm6, %v576_v30  ;;  %v3900_v57 = vld [vmem:[#allocation17_spill] sm:$0xff]  ;;  %v3901_v0 = vld [vmem:[#allocation26_spill] sm:$0xff] }
 0x121   : > { %639 = vst.msk [vmem:[#allocation2 + $0x50] sm:$0xf] %vm634_vm7, %v3508_v24  ;;  %v1279_v24 = vsel %vm3107_vm5, %v1271_v49, %v3896_v43  ;;  %642 = vst.msk [vmem:[#allocation2 + $0x8c] sm:$0xf] %vm634_vm7, %v625_v18  ;;  %v864_v2 = vor.u32 %v3900_v57, %v3899_v8  ;;  %v3902_v63 = vld [vmem:[#allocation27_spill] sm:$0xff]  ;;  %v860_v7 = vsel %vm3027_vm2, %v855_v51, %v3899_v8  ;;  %v3903_v5 = vld [vmem:[#allocation33_spill] sm:$0xff] }
 0x122   : > { %1317 = vst.msk [vmem:[#allocation2 + $0x34] sm:$0xf] %vm585_vm6, %v1261_v44  ;;  %1320 = vst.msk [vmem:[#allocation2 + $0x70] sm:$0xf] %vm585_vm6, %v1288_v58  ;;  %v884_v13 = vor.u32 %v3902_v63, %v3901_v0  ;;  %v880_v18 = vsel %vm3027_vm2, %v875_v10, %v3901_v0  ;;  %v1298_v25 = vrot.slane %v3903_v5, 4  ;;  %v905_v48 = vrot.slane %v904_v46, 4 }
 0x123   : > { %592 = vst.msk [vmem:[#allocation2 + $0x78] sm:$0xf] %vm585_vm6, %v567_v47  ;;  %929 = vst.msk [vmem:[#allocation2 + $0x4] sm:$0xf] %vm585_vm6, %v850_v59  ;;  %v1329_v20 = vld [vmem:[%s2974_s9 + $0x24] sm:$0xf] }
 0x124   : > { %1365 = vst.msk [vmem:[#allocation2 + $0x34] sm:$0xf] %vm634_vm7, %v3542_v28  ;;  %1368 = vst.msk [vmem:[#allocation2 + $0x70] sm:$0xf] %vm634_vm7, %v1350_v53  ;;  %v914_v28 = vor.u32 %v3406_v37, %v3404_v56  ;;  %v895_v37 = vrot.slane %v894_v19, 4  ;;  %v865_v61 = vrot.slane %v864_v2, 4  ;;  %1351 = vrot.lane.b32.xlu0 %v1329_v20, %s2815_s28 }
 0x125   : > { %641 = vst.msk [vmem:[#allocation2 + $0x78] sm:$0xf] %vm634_vm7, %v623_v45  ;;  %v885_v9 = vrot.slane %v884_v13, 4  ;;  %v3904_v4 = vld [vmem:[#allocation37_spill] sm:$0xff]  ;;  %v3906_v40 = vld [vmem:[#allocation40_spill] sm:$0xff]  ;;  %s2719_s9 = sshll.u32 %s2817_s29, 4  ;;  %s2720_s9 = int_to_ptr.vmem [resolvable:$false] %s2719_s9 }
 0x126   : > { %1319 = vst.msk [vmem:[#allocation2 + $0x5c] sm:$0xf] %vm585_vm6, %v1279_v24  ;;  %930 = vst.msk [vmem:[#allocation2 + $0x18] sm:$0xf] %vm585_vm6, %v860_v7  ;;  %v915_v34 = vrot.slane %v914_v28, 4  ;;  %v1306_v55 = vsel %vm3107_vm5, %v1298_v25, %v3904_v4  ;;  %v3905_v15 = vld [vmem:[#allocation29_spill] sm:$0xff]  ;;  %v900_v6 = vsel %vm3027_vm2, %v895_v37, %v3400_v16  ;;  %v870_v12 = vsel %vm3027_vm2, %v865_v61, %v3888_v11  ;;  %p2722_p11 = scmp.lt.s32.totalorder %s3741_s15, %s2720_s9 }
 0x127   : > { %932 = vst.msk [vmem:[#allocation2 + $0x40] sm:$0xf] %vm585_vm6, %v880_v18  ;;  %v1289_v23 = vrot.slane %v3905_v15, 4  ;;  %v890_v3 = vsel %vm3027_vm2, %v885_v9, %v3897_v35  ;;  %v3907_v42 = vrot.slane %v3906_v40, 5  ;;  %1322 = vst.msk [vmem:[#allocation2 + $0x98] sm:$0xf] %vm585_vm6, %v1306_v55  ;;  %v910_v16 = vsel %vm3027_vm2, %v905_v48, %v3404_v56 }
 0x128   : > { %934 = vst.msk [vmem:[#allocation2 + $0x68] sm:$0xf] %vm585_vm6, %v900_v6  ;;  %931 = vst.msk [vmem:[#allocation2 + $0x2c] sm:$0xf] %vm585_vm6, %v870_v12  ;;  %v3908_v41 = vld [vmem:[#allocation36_spill] sm:$0xff]  ;;  %v2668_v54 = vld [vmem:[#allocation3 + $0x110] sm:$0xff]  }
 0x129   : > { %v920_v29 = vsel %vm3027_vm2, %v915_v34, %v3907_v42  ;;  %933 = vst.msk [vmem:[#allocation2 + $0x54] sm:$0xf] %vm585_vm6, %v890_v3  ;;  %v1297_v31 = vsel %vm3107_vm5, %v1289_v23, %v3908_v41  ;;  %935 = vst.msk [vmem:[#allocation2 + $0x7c] sm:$0xf] %vm585_vm6, %v910_v16  ;;  %v2659_v11 = vld [vmem:[#allocation2] ss:$20 sps:$4 sm:$0xff]  }
 0x12a   : > { %936 = vst.msk [vmem:[#allocation2 + $0x90] sm:$0xf] %vm585_vm6, %v920_v29  ;;  %1321 = vst.msk [vmem:[#allocation2 + $0x84] sm:$0xf] %vm585_vm6, %v1297_v31  ;;  %v2665_v49 = vld [vmem:[#allocation2 + $0xc] ss:$20 sps:$4 sm:$0xff]  }
 0x12b   : > { %v2674_v52 = vld [vmem:[#allocation3 + $0x108] sm:$0xff]   ;;  %2018 = vmatprep.mubr.bf16.mxu1 %v2665_v49  ;;  %v2680_v1 = vld [vmem:[#allocation3 + $0x100] sm:$0xff]   ;;  %s2721_s10 = scalar_lea.vmem %s2720_s9, 1024 }
 0x12c   : > { %v2669_v44 = vld [vmem:[#allocation2 + $0x28] ss:$20 sps:$4 sm:$0xff]   ;;  %v2682_v63 = vld [vmem:[#allocation2 + $0x10] ss:$20 sps:$4 sm:$0xff]   ;;  %v2686_v18 = vld [vmem:[#allocation2 + $0x38] ss:$20 sps:$4 sm:$0xff]   ;;  %p2723_p12 = scmp.lt.s32.totalorder %s2721_s10, %s2715_s26 }
 0x12d   : > { %v2672_v24 = vld [vmem:[#allocation2 + $0x34] ss:$20 sps:$4 sm:$0xff]  }
 0x12e   : > { %v2687_v25 = vld [vmem:[#allocation2 + $0x60] ss:$20 sps:$4 sm:$0xff]   ;;  %v2688_v20 = vld [vmem:[#allocation2 + $0x88] ss:$20 sps:$4 sm:$0xff]   ;;  %p2724_p13 = por %p2723_p12, %p2722_p11 }
 0x130   : > { %p2725_p0 = pnand %p2724_p13, %p2718_p10 }
 0x161   : > { %v1034_v22 = vpop.permute.xlu1 %1033 }
 0x162   : > { %1056 = vst.msk [vmem:[#allocation2 + $0x18] sm:$0xf] %vm634_vm7, %v1034_v22 }
 0x168   : > { %v1182_v45 = vpop.permute.xlu0 %1181 }
 0x169   : > { %1205 = vst.msk [vmem:[#allocation2 + $0x8] sm:$0xf] %vm634_vm7, %v1182_v45 }
 0x16d   : > { %v1038_v27 = vpop.permute.xlu1 %1037 }
 0x16e   : > { %1058 = vst.msk [vmem:[#allocation2 + $0x40] sm:$0xf] %vm634_vm7, %v1038_v27 }
 0x173   : > { %v1032_v17 = vpop.permute.xlu0 %1031 }
 0x174   : > { %1055 = vst.msk [vmem:[#allocation2 + $0x4] sm:$0xf] %vm634_vm7, %v1032_v17 }
 0x177   : > { %v1184_v21 = vpop.permute.xlu1 %1183  ;;  %v1348_v56 = vpop.permute.xlu0 %1347 }
 0x178   : > { %1206 = vst.msk [vmem:[#allocation2 + $0x1c] sm:$0xf] %vm634_vm7, %v1184_v21  ;;  %1367 = vst.msk [vmem:[#allocation2 + $0x5c] sm:$0xf] %vm634_vm7, %v1348_v56 }
 0x17b   : > { %v1042_v33 = vpop.permute.xlu1 %1041  ;;  %v1036_v39 = vpop.permute.xlu0 %1035  ;;  %v2661_v32 = vld [vmem:[#allocation2 + $0x4] ss:$20 sps:$4 sm:$0xff]  }
 0x17c   : > { %1060 = vst.msk [vmem:[#allocation2 + $0x68] sm:$0xf] %vm634_vm7, %v1042_v33  ;;  %1057 = vst.msk [vmem:[#allocation2 + $0x2c] sm:$0xf] %vm634_vm7, %v1036_v39  ;;  %1953 = vmatprep.mubr.bf16.mxu0 %v2661_v32  ;;  %v2343_v33 = vld [vmem:[%s3818_s2] ss:$0 sm:$0xff] }
 0x17d   : > { %1954 = vmatmul.mubr.bf16.vlgmr.msra.gmra.mxu0 %v2659_v11 }
 0x17e   : > { %2540 = vmatpush3.bf16.msra.mxu0 %v3428_v50 }
 0x17f   : > { %v2663_v36 = vld [vmem:[#allocation2 + $0x8] ss:$20 sps:$4 sm:$0xff]   ;;  %v1040_v26 = vpop.permute.xlu0 %1039  ;;  %2541 = vmatprep.subr.bf16.mxu0 %v2668_v54 }
 0x180   : > { %1059 = vst.msk [vmem:[#allocation2 + $0x54] sm:$0xf] %vm634_vm7, %v1040_v26  ;;  %2019 = vmatmul.mubr.bf16.vlgmr.msra.gmra.mxu1 %v2663_v36  ;;  %v2678_v28 = vld [vmem:[#allocation2 + $0x5c] ss:$20 sps:$4 sm:$0xff]  }
 0x181   : > { %v1188_v30 = vpop.permute.xlu1 %1187  ;;  %2559 = vmatpush3.bf16.msra.mxu1 %v3428_v50  ;;  %2026 = vmatprep.mubr.bf16.mxu1 %v2672_v24 }
 0x182   : > { %1208 = vst.msk [vmem:[#allocation2 + $0x44] sm:$0xf] %vm634_vm7, %v1188_v30  ;;  %2542 = vmatpush3.bf16.msra.mxu0 %v2668_v54  ;;  %2556 = vmatprep.subr.bf16.mxu1 %v2668_v54 }
 0x183   : > { %v2666_v38 = vld [vmem:[#allocation2 + $0x2c] ss:$20 sps:$4 sm:$0xff]   ;;  %2543 = vmatprep.subr.bf16.mxu0 %v2674_v52  ;;  %v1504_v10 = vld [vmem:[#allocation2 + $0x64] sm:$0xff] }
 0x184   : > { %v1186_v14 = vpop.permute.xlu0 %1185  ;;  %1961 = vmatprep.mubr.bf16.mxu0 %v2666_v38 }
 0x185   : > { %v1046_v58 = vpop.permute.xlu1 %1045  ;;  %1207 = vst.msk [vmem:[#allocation2 + $0x30] sm:$0xf] %vm634_vm7, %v1186_v14  ;;  %1962 = vmatmul.mubr.bf16.gmra.mxu0 %v2669_v44  ;;  %2560 = vmatpush3.bf16.msra.mxu1 %v2668_v54 }
 0x186   : > { %1062 = vst.msk [vmem:[#allocation2 + $0x90] sm:$0xf] %vm634_vm7, %v1046_v58  ;;  %2544 = vmatpush3.bf16.msra.mxu0 %v2674_v52  ;;  %2557 = vmatprep.subr.bf16.mxu1 %v2674_v52 }
 0x187   : > { %v2670_v47 = vld [vmem:[#allocation2 + $0x54] ss:$20 sps:$4 sm:$0xff]   ;;  %2545 = vmatprep.subr.bf16.mxu0 %v2680_v1 }
 0x188   : > { %v1044_v51 = vpop.permute.xlu0 %1043  ;;  %v1501_v50 = vld [vmem:[#allocation2 + $0x50] sm:$0xff]  ;;  %1969 = vmatprep.mubr.bf16.mxu0 %v2670_v47 }
 0x189   : > { %v1192_v53 = vpop.permute.xlu1 %1191  ;;  %1061 = vst.msk [vmem:[#allocation2 + $0x7c] sm:$0xf] %vm634_vm7, %v1044_v51  ;;  %2561 = vmatpush3.bf16.msra.mxu1 %v2674_v52  ;;  %v2354_v62 = vcombine.low %v1501_v50, %v1504_v10 }
 0x18a   : > { %1210 = vst.msk [vmem:[#allocation2 + $0x6c] sm:$0xf] %vm634_vm7, %v1192_v53  ;;  %2546 = vmatpush3.bf16.msra.mxu0 %v2680_v1  ;;  %2558 = vmatprep.subr.bf16.mxu1 %v2680_v1 }
 0x18c   : > { %v1190_v43 = vpop.permute.xlu0 %1189  ;;  %v2675_v35 = vld [vmem:[#allocation2 + $0x30] ss:$20 sps:$4 sm:$0xff]  }
 0x18d   : > { %v1196_v59 = vpop.permute.xlu1 %1195  ;;  %1209 = vst.msk [vmem:[#allocation2 + $0x58] sm:$0xf] %vm634_vm7, %v1190_v43  ;;  %1970 = vmatmul.mubr.bf16.gmra.mxu0 %v2354_v62  ;;  %2562 = vmatpush3.bf16.msra.mxu1 %v2680_v1  ;;  %v1510_v2 = vld [vmem:[#allocation2 + $0x8c] sm:$0xff] }
 0x18e   : > { %1212 = vst.msk [vmem:[#allocation2 + $0x94] sm:$0xf] %vm634_vm7, %v1196_v59  ;;  %2027 = vmatmul.mubr.bf16.gmra.mxu1 %v2675_v35 }
 0x18f   : > { %2034 = vmatprep.mubr.bf16.mxu1 %v2678_v28 }
 0x190   : > { %v1194_v19 = vpop.permute.xlu0 %1193  ;;  %v1507_v8 = vld [vmem:[#allocation2 + $0x78] sm:$0xff] }
 0x191   : > { %v1354_v60 = vpop.permute.xlu1 %1353  ;;  %v2676_v57 = vld [vmem:[#allocation2 + $0x7c] ss:$20 sps:$4 sm:$0xff]   ;;  %1211 = vst.msk [vmem:[#allocation2 + $0x80] sm:$0xf] %vm634_vm7, %v1194_v19  ;;  %v2359_v0 = vcombine.low %v1507_v8, %v1510_v2 }
 0x192   : > { %1370 = vst.msk [vmem:[#allocation2 + $0x98] sm:$0xf] %vm634_vm7, %v1354_v60  ;;  %1977 = vmatprep.mubr.bf16.mxu0 %v2676_v57 }
 0x194   : > { %v2681_v7 = vld [vmem:[#allocation2 + $0x58] ss:$20 sps:$4 sm:$0xff]  }
 0x195   : > { %1978 = vmatmul.mubr.bf16.gmra.mxu0 %v2359_v0 }
 0x196   : > { %v1352_v13 = vpop.permute.xlu0 %1351  ;;  %2547 = vmatprep.mubr.msk.bf16.mxu0 %vm1908_vm8, %v2682_v63  ;;  %2035 = vmatmul.mubr.bf16.gmra.mxu1 %v2681_v7 }
 0x197   : > { %1369 = vst.msk [vmem:[#allocation2 + $0x84] sm:$0xf] %vm634_vm7, %v1352_v13 }
 0x198   : > { %v2685_v5 = vld [vmem:[#allocation2 + $0x80] ss:$20 sps:$4 sm:$0xff]  }
 0x19d   : > { %2548 = vmatmul.mubr.msk.bf16.vlgmr.msra.gmra.mxu0 %vm1908_vm8, %v2686_v18 }
 0x19e   : > { %v2683_v46 = vld [vmem:[#allocation2 + $0x84] ss:$20 sps:$4 sm:$0xff]  }
 0x19f   : > { %2042 = vmatprep.mubr.bf16.mxu1 %v2683_v46 }
 0x1a0   : > { %2043 = vmatmul.mubr.bf16.gmra.mxu1 %v2685_v5 }
 0x1a1   : > { %2551 = vmatprep.mubr.msk.bf16.mxu1 %vm1908_vm8, %v2687_v25 }
 0x1a8   : > { %2552 = vmatmul.mubr.msk.bf16.vlgmr.msra.gmra.mxu1 %vm1908_vm8, %v2688_v20 }
 0x23d   : > { %v2467_v37 = vpop.f32.mrf.mxu0 }
 0x23f   : > { %v2468_v61 = vpop.f32.mrf.mxu0 }
 0x240   : > { %v2507_v9 = vpop.f32.mrf.mxu1  ;;  %v2469_v17 = vadd.f32 %v2468_v61, %v2467_v37 }
 0x241   : > { %v2470_v34 = vpop.f32.mrf.mxu0 }
 0x242   : > { %v2508_v4 = vpop.f32.mrf.mxu1  ;;  %v1956_v49 = vadd.f32 %v2469_v17, %v2343_v33 }
 0x243   : > { %v2471_v48 = vpop.f32.mrf.mxu0  ;;  %v2509_v26 = vadd.f32 %v2508_v4, %v2507_v9 }
 0x244   : > { %v2510_v23 = vpop.f32.mrf.mxu1  ;;  %v2472_v32 = vadd.f32 %v2471_v48, %v2470_v34 }
 0x245   : > { %v2473_v55 = vpop.f32.mrf.mxu0  ;;  %v2021_v10 = vadd.f32 %v2509_v26, %v1956_v49 }
 0x246   : > { %v2511_v3 = vpop.f32.mrf.mxu1  ;;  %v1959_v14 = vadd.f32 %v2472_v32, %v2343_v33 }
 0x247   : > { %v2474_v15 = vpop.f32.mrf.mxu0  ;;  %v2512_v47 = vadd.f32 %v2511_v3, %v2510_v23 }
 0x248   : > { %v2475_v54 = vadd.f32 %v2474_v15, %v2473_v55 }
 0x249   : > { %v2476_v6 = vpop.f32.mrf.mxu0  ;;  %v2024_v2 = vadd.f32 %v2512_v47, %v1959_v14 }
 0x24a   : > { %v1964_v53 = vadd.f32 %v2475_v54, %v2343_v33 }
 0x24b   : > { %v2477_v12 = vpop.f32.mrf.mxu0 }
 0x24c   : > { %v2478_v36 = vadd.f32 %v2477_v12, %v2476_v6 }
 0x24d   : > { %v2479_v40 = vpop.f32.mrf.mxu0 }
 0x24e   : > { %v2513_v42 = vpop.f32.mrf.mxu1  ;;  %v1967_v51 = vadd.f32 %v2478_v36, %v2343_v33 }
 0x24f   : > { %v2480_v29 = vpop.f32.mrf.mxu0 }
 0x250   : > { %v2514_v16 = vpop.f32.mrf.mxu1  ;;  %v2481_v24 = vadd.f32 %v2480_v29, %v2479_v40 }
 0x251   : > { %v2482_v41 = vpop.f32.mrf.mxu0  ;;  %v2515_v38 = vadd.f32 %v2514_v16, %v2513_v42 }
 0x252   : > { %v2516_v31 = vpop.f32.mrf.mxu1  ;;  %v1972_v5 = vadd.f32 %v2481_v24, %v2343_v33 }
 0x253   : > { %v2483_v22 = vpop.f32.mrf.mxu0  ;;  %v2029_v59 = vadd.f32 %v2515_v38, %v1964_v53 }
 0x254   : > { %v2517_v45 = vpop.f32.mrf.mxu1  ;;  %v2484_v25 = vadd.f32 %v2483_v22, %v2482_v41 }
 0x255   : > { %v2485_v27 = vpop.f32.mrf.mxu0  ;;  %v2518_v44 = vadd.f32 %v2517_v45, %v2516_v31 }
 0x256   : > { %v2519_v21 = vpop.f32.mrf.mxu1  ;;  %v1975_v29 = vadd.f32 %v2484_v25, %v2343_v33 }
 0x257   : > { %v2486_v56 = vpop.f32.mrf.mxu0  ;;  %v2032_v43 = vadd.f32 %v2518_v44, %v1967_v51 }
 0x258   : > { %v2520_v39 = vpop.f32.mrf.mxu1  ;;  %v2487_v0 = vadd.f32 %v2486_v56, %v2485_v27 }
 0x259   : > { %v2488_v11 = vpop.f32.mrf.mxu0  ;;  %v2521_v63 = vadd.f32 %v2520_v39, %v2519_v21 }
 0x25a   : > { %v2522_v52 = vpop.f32.mrf.mxu1  ;;  %v1980_v55 = vadd.f32 %v2487_v0, %v2343_v33 }
 0x25b   : > { %v2489_v30 = vpop.f32.mrf.mxu0  ;;  %v2037_v6 = vadd.f32 %v2521_v63, %v1972_v5 }
 0x25c   : > { %v2523_v1 = vpop.f32.mrf.mxu1  ;;  %v2490_v7 = vadd.f32 %v2489_v30, %v2488_v11 }
 0x25d   : > { %v2549_v58 = vpop.f32.mrf.mxu0  ;;  %v2524_v15 = vadd.f32 %v2523_v1, %v2522_v52 }
 0x25e   : > { %v2094_v8 = vadd.f32 %v2549_v58, %v2029_v59  ;;  %v1983_v12 = vadd.f32 %v2490_v7, %v2343_v33 }
 0x25f   : > { %v2085_v62 = vpop.f32.mrf.mxu0  ;;  %v2040_v39 = vadd.f32 %v2524_v15, %v1975_v29 }
 0x260   : > { %v2525_v50 = vpop.f32.mrf.mxu1  ;;  %v2086_v60 = vadd.f32 %v2085_v62, %v2021_v10  ;;  %v2171_v3 = vmul.f32 %v2094_v8, %v2094_v8 }
 0x261   : > { %v2550_v19 = vpop.f32.mrf.mxu0 }
 0x262   : > { %v2526_v35 = vpop.f32.mrf.mxu1  ;;  %v2097_v57 = vadd.f32 %v2550_v19, %v2032_v43  ;;  %v2169_v37 = vmul.f32 %v2086_v60, %v2086_v60 }
 0x263   : > { %v2088_v28 = vpop.f32.mrf.mxu0  ;;  %v2527_v20 = vadd.f32 %v2526_v35, %v2525_v50 }
 0x264   : > { %v2528_v13 = vpop.f32.mrf.mxu1  ;;  %v2436_v18 = vpack.c.bf16 %v2097_v57, %v2094_v8  ;;  %v2089_v46 = vadd.f32 %v2088_v28, %v2024_v2  ;;  %v2172_v16 = vmul.f32 %v2097_v57, %v2097_v57 }
 0x265   : > { %v2045_v41 = vadd.f32 %v2527_v20, %v1980_v55 }
 0x266   : > { %v2529_v61 = vpop.f32.mrf.mxu1  ;;  %2448 = vst [vmem:[%s3735_s14 + $0x8] sm:$0xff] %v2436_v18   ;;  %v2431_v34 = vpack.c.bf16 %v2089_v46, %v2086_v60  ;;  %v2156_v48 = vadd.f32 %v2089_v46, %v2086_v60  ;;  %v2170_v4 = vmul.f32 %v2089_v46, %v2089_v46 }
 0x267   : > { %v2530_v9 = vadd.f32 %v2529_v61, %v2528_v13 }
 0x268   : > { %v2553_v23 = vpop.f32.mrf.mxu1  ;;  %2432 = vst [vmem:[%s3735_s14] sm:$0xff] %v2431_v34   ;;  %v2157_v40 = vadd.f32 %v2156_v48, %v2094_v8  ;;  %v2177_v42 = vadd.f32 %v2170_v4, %v2169_v37 }
 0x269   : > { %v2048_v17 = vadd.f32 %v2530_v9, %v1983_v12  ;;  %v2110_v21 = vadd.f32 %v2553_v23, %v2045_v41 }
 0x26a   : > { %v2101_v31 = vpop.f32.mrf.mxu1  ;;  %v2178_v22 = vadd.f32 %v2177_v42, %v2171_v3  ;;  %v2158_v27 = vadd.f32 %v2157_v40, %v2097_v57 }
 0x26b   : > { %v2102_v45 = vadd.f32 %v2101_v31, %v2037_v6  ;;  %v2175_v1 = vmul.f32 %v2110_v21, %v2110_v21 }
 0x26c   : > { %v2554_v56 = vpop.f32.mrf.mxu1  ;;  %v2179_v54 = vadd.f32 %v2178_v22, %v2172_v16 }
 0x26d   : > { %v2159_v11 = vadd.f32 %v2158_v27, %v2102_v45  ;;  %v2173_v32 = vmul.f32 %v2102_v45, %v2102_v45  ;;  %v2113_v36 = vadd.f32 %v2554_v56, %v2048_v17 }
 0x26e   : > { %v2104_v33 = vpop.f32.mrf.mxu1 }
 0x26f   : > { %v2180_v49 = vadd.f32 %v2179_v54, %v2173_v32  ;;  %v2446_v26 = vpack.c.bf16 %v2113_v36, %v2110_v21  ;;  %v2105_v52 = vadd.f32 %v2104_v33, %v2040_v39 }
 0x271   : > { %2450 = vst [vmem:[%s3735_s14 + $0x18] sm:$0xff] %v2446_v26   ;;  %v2441_v30 = vpack.c.bf16 %v2105_v52, %v2102_v45  ;;  %v2160_v38 = vadd.f32 %v2159_v11, %v2105_v52  ;;  %v2174_v44 = vmul.f32 %v2105_v52, %v2105_v52 }
 0x273   : > { %2449 = vst [vmem:[%s3735_s14 + $0x10] sm:$0xff] %v2441_v30   ;;  %v2161_v58 = vadd.f32 %v2160_v38, %v2110_v21  ;;  %v2181_v14 = vadd.f32 %v2180_v49, %v2174_v44 }
 0x274   : > { %2728 = shalt.err (!%p2725_p0)
}
 0x275   : > { %s2729_s11 = scalar_lea.hbm %s3747_s19, 512  ;;  %s2733_s16 = scalar_lea.hbm %s3821_s5, 1024 }
 0x276   : > { %p2730_p1 = scmp.ne.s32.totalorder %s3747_s19, %s2729_s11  ;;  %p2734_p4 = scmp.lt.s32.totalorder %s3747_s19, %s3821_s5 }
 0x277   : > { %p2735_p7 = scmp.lt.s32.totalorder %s2733_s16, %s2729_s11 }
 0x278   : > { %p2731_p2 = pnand %p2730_p1, %p2893_p5 }
 0x279   : > { %p2736_p6 = por %p2735_p7, %p2734_p4 }
 0x27a   : > { %p2732_p3 = pneg %p2731_p2 }
 0x27c   : > { %p2737_p8 = pnand %p2736_p6, %p2732_p3 }
 0x27e   : > { %2740 = shalt.err (!%p2737_p8)
}
 0x27f   : > { %s2818_s26 = smov 4   ;;  %v2176_v47 = vmul.f32 %v2113_v36, %v2113_v36  ;;  %v2162_v53 = vadd.f32 %v2161_v58, %v2113_v36  ;;  %v2182_v51 = vadd.f32 %v2181_v14, %v2175_v1  ;;  %s2338_s29 = sshll.u32 %s3732_s12, 1  ;;  %vm2190_vm9 = vcmask 1040384  }
 0x280   : > { %2568 = dma.vmem_to_hbm [thread:$0]  (%p2893_p5), %s3741_s15, 512, %s3747_s19, %s2194_s20, %s2815_s28, %s2815_s28, %s2818_s26  }
 0x281   : > { %v2163_v50 = vrot.slane %v2162_v53, 4  ;;  %v2183_v10 = vadd.f32 %v2182_v51, %v2176_v47  ;;  %s2416_s9 = sshll.u32 %s2876_s25, 5  ;;  %s270_s28 = scalar_lea.vmem [#allocation7], %s2338_s29 }
 0x282   : > { %s2228_s15 = sshll.u32 %s270_s28, 4  ;;  %s3780_s10 = scalar_lea.hbm %s3822_s6, %s2416_s9  ;;  %s2229_s15 = int_to_ptr.vmem [resolvable:$true] %s2228_s15 }
 0x283   : > { %v2164_v62 = vadd.f32 %v2163_v50, %v2162_v53  ;;  %v2184_v59 = vrot.slane %v2183_v10, 4  ;;  %s2199_s11 = scalar_lea.sflag [#allocation8], %s3732_s12  ;;  %s2741_s13 = scalar_lea.vmem %s2229_s15, 32 }
 0x284   : > { %p2742_p9 = scmp.ne.s32.totalorder %s2229_s15, %s2741_s13  ;;  %s2819_s25 = smov [#allocation7]  }
 0x285   : > { %v2165_v43 = vrot.slane %v2164_v62, 2  ;;  %v2185_v24 = vadd.f32 %v2184_v59, %v2183_v10  ;;  %s2745_s14 = sshll.u32 %s2819_s25, 4  ;;  %s2746_s14 = int_to_ptr.vmem [resolvable:$false] %s2745_s14 }
 0x286   : > { %p2743_p10 = pnand %p2742_p9, %p2893_p5  ;;  %s2747_s16 = scalar_lea.vmem %s2746_s14, 64 }
 0x287   : > { %v2166_v35 = vadd.f32 %v2165_v43, %v2164_v62  ;;  %v2186_v60 = vrot.slane %v2185_v24, 2  ;;  %p2748_p12 = scmp.lt.s32.totalorder %s2229_s15, %s2746_s14  ;;  %p2749_p13 = scmp.lt.s32.totalorder %s2747_s16, %s2741_s13 }
 0x288   : > { %p2744_p11 = pneg %p2743_p10 }
 0x289   : > { %v2167_v19 = vrot.slane %v2166_v35, 1  ;;  %v2187_v8 = vadd.f32 %v2186_v60, %v2185_v24  ;;  %p2750_p0 = por %p2749_p13, %p2748_p12 }
 0x28b   : > { %v2188_v57 = vrot.slane %v2187_v8, 1  ;;  %v2168_v2 = vadd.f32 %v2167_v19, %v2166_v35  ;;  %p2751_p1 = pnand %p2750_p0, %p2744_p11 }
 0x28d   : > { %v2189_v0 = vadd.f32 %v2188_v57, %v2187_v8 }
 0x28f   : > { %v2191_v63 = vsel %vm2190_vm9, %v2168_v2, %v2189_v0 }
 0x290   : > { %2192 = vst [vmem:[%s270_s28] sm:$0x3] %v2191_v63 }
 0x291   : > { %2754 = shalt.err (!%p2751_p1)
}
 0x292   : > { %s2755_s17 = scalar_lea.hbm %s3780_s10, 32  ;;  %s2759_s26 = scalar_lea.hbm %s3822_s6, 64 }
 0x293   : > { %p2756_p2 = scmp.ne.s32.totalorder %s3780_s10, %s2755_s17  ;;  %p2760_p7 = scmp.lt.s32.totalorder %s3780_s10, %s3822_s6 }
 0x294   : > { %p2761_p6 = scmp.lt.s32.totalorder %s2759_s26, %s2755_s17 }
 0x295   : > { %p2757_p3 = pnand %p2756_p2, %p2893_p5 }
 0x296   : > { %p2762_p8 = por %p2761_p6, %p2760_p7 }
 0x297   : > { %p2758_p4 = pneg %p2757_p3 }
 0x299   : > { %p2763_p9 = pnand %p2762_p8, %p2758_p4 }
 0x29b   : > { %2766 = shalt.err (!%p2763_p9)
}
 0x29c   : > { %2569 = dma.vmem_to_hbm [thread:$0]  (%p2893_p5), %s2229_s15, 32, %s3780_s10, %s2199_s11  }
 0x29d PF: > { %p2585_p10 = scmp.ge.s32.totalorder %s2809_s24, 2  ;;  %s2240_s28 = sand.u32 1, %s2797_s21  }
 0x29e   : > { %p3909_p11 = scmp.ne.s32.totalorder %s3837_s8, 0  ;;  %s2241_s19 = scalar_lea.sflag [#allocation5], %s2240_s28 }
 0x2a0   : > { %p2577_p12 = pnand %p2585_p10, %p3909_p11 }
 0x2a2   : > { %p2578_p13 = pneg %p2577_p12 }
 0x2a4   : > { %2788 = dma.done.wait (%p2578_p13), %s2241_s19, 512  }
 0x2a5   : > { %2790 = vsyncadd (%p2578_p13), %s2241_s19, 4294966784  ;;  %s2250_s20 = scalar_lea.sflag [#allocation8], %s2240_s28 }
 0x2a6   : > { %2792 = dma.done.wait (%p2578_p13), %s2250_s20, 32  }
 0x2a7   : > { %2794 = vsyncadd (%p2578_p13), %s2250_s20, 4294967264  ;;  %p21_p5 = scmp.ge.s32.totalorder %s2880_s27, 4   ;;  %s3910_s21 = smov %s2801_s22 }
 0x2a8   : > { %s3911_s22 = smov %s2805_s23  ;;  %s3912_s23 = smov %s2891_s30 }
 0x2a9   : > { %s3913_s24 = smov %s2880_s27  ;;  %23 = sbr.rel (!%p21_p5) target bundleno = 6 (0x6), region = 97 }
 0x2ae   :  { %2255 = vsyncpa [#allocation4], 1 }
 0x2af   :  { %2257 = vsyncpa [#allocation4 + $0x1], 1 }
 0x2b0   :  { %2258 = vsyncpa [#allocation5], 1 }
 0x2b1   :  { %2260 = vsyncpa [#allocation5 + $0x1], 1 }
 0x2b2   :  { %2261 = vsyncpa [#allocation8], 1 }
 0x2b3   :  { %2263 = vsyncpa [#allocation8 + $0x1], 1 }

</bundles_post_ra>
